<compile_context>
chip_gen: v5e
topology: v5e:2x2
jax: 0.10.0
libtpu: 0.0.40
codegen_flags: <defaults>
</compile_context>

<pallas_src>
import math

import jax
import jax.numpy as jnp
from jax.experimental import pallas as pl
from jax.experimental.pallas import tpu as pltpu


def _round_up(x, m):
    return ((x + m - 1) // m) * m


def _ifft_ola_kernel(spec_ref, w_ref, scale_ref, bias_ref, out_ref):
    """One grid step: inverse-DFT a tile of frames (per hop-quarter) and
    overlap-add it into the resident per-batch OLA buffer; on the last time
    step apply the fused bias / x2 / Hann^2-rescale epilogue in place.

    spec_ref  : (2, tt, half)   f32   real / imag spectrogram rows of this tile
    w_ref     : (n_fft, n_fft)  bf16  IDFT synthesis matrix (loop invariant)
    scale_ref : (t_rows, hop)   f32   padded Rescale buffer (loop invariant)
    bias_ref  : (1,)            f32   ConvTranspose2d bias (SMEM scalar)
    out_ref   : (t_rows, hop)   f32   whole OLA buffer of this batch (resident)
    """
    _, tt, half = spec_ref.shape
    n_fft = 2 * half
    hop = n_fft // 4
    t_rows = out_ref.shape[0]
    t = pl.program_id(1)

    # Minimal init: only the 3 head rows and 5 tail rows are never covered by
    # the s=3 plain stores below; everything else is written by `=` first.
    @pl.when(t == 0)
    def _init():
        out_ref[0:3, :] = jnp.zeros((3, hop), jnp.float32)
        out_ref[t_rows - 5:t_rows, :] = jnp.zeros((5, hop), jnp.float32)

    # Cast the f32 spectrogram tile to bf16 once (MXU operands).
    xr = spec_ref[0].astype(jnp.bfloat16)          # (tt, half)  real rows
    xi = spec_ref[1].astype(jnp.bfloat16)          # (tt, half)  imag rows

    # Global frame f = t*tt + i starts at sample f*hop, i.e. its four hop-wide
    # quarters land in OLA rows f, f+1, f+2, f+3.
    t0 = pl.multiple_of(t * tt, 8)

    # Quarter s=3 first: rows [t0+3, t0+tt+3) are untouched at this step, so a
    # plain store both initializes them and avoids one read-modify-write pass.
    for s in (3, 0, 1, 2):
        q = jnp.dot(xr, w_ref[0:half, s * hop:(s + 1) * hop],
                    preferred_element_type=jnp.float32)
        q = q + jnp.dot(xi, w_ref[half:n_fft, s * hop:(s + 1) * hop],
                        preferred_element_type=jnp.float32)
        if s == 3:
            out_ref[pl.ds(t0 + 3, tt), :] = q
        else:
            out_ref[pl.ds(t0 + s, tt), :] += q      # s=0 is the 8-aligned one

    # Fused epilogue: ConvTranspose bias, x2, Hann^2 rescale, applied to the
    # resident block right before it is written back to HBM.
    @pl.when(t == pl.num_programs(1) - 1)
    def _finalize():
        inv = pl.reciprocal(scale_ref[...] + 1e-7, approx=True)
        out_ref[...] = (2.0 * (out_ref[...] + bias_ref[0])) * inv


def ifftconv_forward(spec, w_mat, bias, scale_factor, *, n_fft, audio_size,
                     frames_per_tile=None):
    """Pallas forward of IFFTConv.

    spec:         (B, 2, T, n_fft//2) float32 (channel 0 = real, 1 = imag)
    w_mat:        (n_fft, n_fft) bfloat16 IDFT synthesis matrix
    bias:         () float32 ConvTranspose2d bias (out_channels = 1)
    scale_factor: (audio_size,) float32 Hann^2 overlap normalization buffer
    returns:      (B, 1, audio_size) float32
    """
    B, two, T, half = spec.shape
    assert two == 2 and half == n_fft // 2
    assert n_fft % 512 == 0, "need hop = n_fft/4 to be a multiple of 128 lanes"
    hop = n_fft // 4
    l_conv = (T - 1) * hop + n_fft          # transposed-conv output length
    assert l_conv >= audio_size

    # Hardware query: physical VMEM drives both the default frame tile and the
    # scoped-VMEM request (don't ask for all of v7x's 64 MiB).
    try:
        phys_vmem = int(getattr(pltpu.get_tpu_info(), "vmem_capacity_bytes",
                                128 << 20))
    except Exception:                        # pragma: no cover - robustness
        phys_vmem = 128 << 20
    if frames_per_tile is None:
        frames_per_tile = 512 if phys_vmem >= (96 << 20) else 256
    assert frames_per_tile % 8 == 0

    # Time tiling: tt frame rows per grid step.
    tt = _round_up(min(frames_per_tile, _round_up(T, 8)), 8)
    num_t = pl.cdiv(T, tt)
    t_pad = num_t * tt
    if t_pad != T:
        spec = jnp.pad(spec, ((0, 0), (0, 0), (0, t_pad - T), (0, 0)))
    t_rows = t_pad + 8                       # OLA rows, each hop samples wide

    # Rescale buffer laid out on the OLA grid (lane-dense (t_rows, hop) plane).
    # Positions outside the center crop are padded with 1.0 (cropped away).
    # In a real model this depends only on static config and is built once.
    left = (l_conv - audio_size) // 2
    scale_plane = jnp.ones((t_rows * hop,), jnp.float32)
    scale_plane = scale_plane.at[left:left + audio_size].set(
        scale_factor.astype(jnp.float32))
    scale_plane = scale_plane.reshape(t_rows, hop)

    bias_arr = jnp.reshape(jnp.asarray(bias, jnp.float32), (1,))

    flops = 2 * B * t_pad * n_fft * n_fft
    bytes_accessed = (B * 2 * t_pad * half * 4    # f32 spec, read once
                      + n_fft * n_fft * 2         # bf16 W
                      + t_rows * hop * 4          # scale plane
                      + B * t_rows * hop * 4)     # OLA writeback
    vmem_need = (2 * (2 * tt * half * 4)          # f32 spec block, 2 buffers
                 + 1 * (n_fft * n_fft * 2)        # bf16 W, Buffered(1)
                 + 1 * (t_rows * hop * 4)         # scale plane, Buffered(1)
                 + 2 * (t_rows * hop * 4)         # resident OLA out, 2 buffers
                 + 2 * (tt * half * 2)            # bf16 xr/xi temporaries
                 + 2 * (tt * hop * 4))            # f32 quarter temporaries
    headroom = 16 << 20
    cap = max(min(phys_vmem - headroom, 100 << 20), 24 << 20)
    vmem_limit = int(min(max(vmem_need + (4 << 20), 32 << 20), cap))

    ola = pl.pallas_call(
        _ifft_ola_kernel,
        out_shape=jax.ShapeDtypeStruct((B, t_rows, hop), jnp.float32),
        grid=(B, num_t),
        in_specs=[
            # Raw f32 spectrogram tile (both channels), streamed over time.
            pl.BlockSpec((None, 2, tt, half), lambda b, t: (b, 0, t, 0)),
            # IDFT matrix: constant index map, single pipeline buffer.
            pl.BlockSpec((n_fft, n_fft), lambda b, t: (0, 0),
                         pipeline_mode=pl.Buffered(1)),
            # Rescale plane: constant index map, single pipeline buffer.
            pl.BlockSpec((t_rows, hop), lambda b, t: (0, 0),
                         pipeline_mode=pl.Buffered(1)),
            # ConvTranspose bias scalar in SMEM.
            pl.BlockSpec(memory_space=pltpu.MemorySpace.SMEM),
        ],
        # Constant index over t -> the per-batch OLA buffer stays resident in
        # VMEM across the whole time axis and is written back once per batch.
        out_specs=pl.BlockSpec((None, t_rows, hop), lambda b, t: (b, 0, 0)),
        compiler_params=pltpu.CompilerParams(
            dimension_semantics=("parallel", "arbitrary"),
            vmem_limit_bytes=vmem_limit),
        cost_estimate=pl.CostEstimate(flops=int(flops), transcendentals=0,
                                      bytes_accessed=int(bytes_accessed)),
    )(spec, w_mat, scale_plane, bias_arr)

    # Only the Conv2dT center crop remains outside the kernel; it fuses with
    # downstream consumers in a real pipeline.
    audio = ola.reshape(B, t_rows * hop)[:, left:left + audio_size]
    return audio[:, None, :]                 # (B, 1, audio_size)


def make_ifftconv_params(n_fft, audio_size, key):
    """Fixed IDFT weights, ConvTranspose bias and Rescale buffer, built exactly
    as IFFTConv.__init__ / Rescale.__init__ do."""
    half = n_fft // 2
    k = jnp.arange(half, dtype=jnp.float32)[:, None]     # input channel / bin
    m = jnp.arange(n_fft, dtype=jnp.float32)[None, :]    # sample within frame
    ang = 2.0 * math.pi * k * m / n_fft
    inv_sqrt_n = 1.0 / math.sqrt(n_fft)
    # np.fft.fft(eye(N))[m, k] = exp(-2*pi*i*m*k/N); torch weight[c, 0, 0, m]:
    #   c = k        -> +cos(2*pi*m*k/N)/sqrt(N)   (DC column halved)
    #   c = half + k -> -sin(2*pi*m*k/N)/sqrt(N)   (DC column halved; zero)
    w_cos = (jnp.cos(ang) * inv_sqrt_n).at[0, :].multiply(0.5)
    w_sin = (-jnp.sin(ang) * inv_sqrt_n).at[0, :].multiply(0.5)
    w_mat = jnp.concatenate([w_cos, w_sin], axis=0)       # (n_fft, n_fft)

    # The reference module keeps ConvTranspose2d's default (random) bias; draw
    # it deterministically with the same U(-1/sqrt(fan_in), +1/sqrt(fan_in)).
    bound = 1.0 / math.sqrt(n_fft)
    bias = jax.random.uniform(key, (), minval=-bound, maxval=bound,
                              dtype=jnp.float32)

    # Rescale buffer: sum of squared periodic Hann windows at stride n_fft/2
    # (the module really uses n_fft/2 here although the conv hop is n_fft/4 --
    # reproduced faithfully).
    stride = n_fft // 2
    padding_size = int((math.ceil(audio_size / stride) - 1) * stride
                       + n_fft - audio_size)
    mm = jnp.arange(n_fft, dtype=jnp.float32)
    hann_sq = jnp.square(0.5 * (1.0 - jnp.cos(2.0 * math.pi * mm / n_fft)))
    sf = jnp.zeros((audio_size + padding_size,), jnp.float32)
    for i in range(audio_size // stride):
        sf = sf.at[i * stride:i * stride + n_fft].add(hann_sq)
    start = padding_size // 2
    scale_factor = sf[start:start + audio_size]

    return w_mat.astype(jnp.bfloat16), bias, scale_factor


def ifftconv_reference(spec, w_mat, bias, scale_factor, *, n_fft, audio_size):
    """Pure-JAX reference (same bf16 operands, f32 accumulation)."""
    B, _, T, _ = spec.shape
    hop = n_fft // 4
    spec_cat = jnp.concatenate([spec[:, 0], spec[:, 1]], axis=-1)
    spec_f32 = spec_cat.astype(jnp.bfloat16).astype(jnp.float32)
    frames = jnp.einsum('btc,cm->btm', spec_f32, w_mat.astype(jnp.float32))
    l_conv = (T - 1) * hop + n_fft
    ola = jnp.zeros((B, l_conv), jnp.float32)
    for t in range(T):
        ola = ola.at[:, t * hop:t * hop + n_fft].add(frames[:, t, :])
    left = (l_conv - audio_size) // 2
    audio = ola[:, left:left + audio_size]
    out = 2.0 * (audio + bias) / (scale_factor[None, :] + 1e-7)
    return out[:, None, :]


if __name__ == "__main__":
    key = jax.random.PRNGKey(0)

    def run(n_fft, num_frames, audio_size, frames_per_tile, kx, kp):
        B = 2
        half = n_fft // 2
        spec = jax.random.normal(kx, (B, 2, num_frames, half),
                                 dtype=jnp.float32)
        w_mat, bias, scale_factor = make_ifftconv_params(n_fft, audio_size, kp)
        out = ifftconv_forward(spec, w_mat, bias, scale_factor, n_fft=n_fft,
                               audio_size=audio_size,
                               frames_per_tile=frames_per_tile)
        out = jax.block_until_ready(out)
        assert out.shape == (B, 1, audio_size), out.shape
        ref = ifftconv_reference(spec, w_mat, bias, scale_factor, n_fft=n_fft,
                                 audio_size=audio_size)
        ref = jax.block_until_ready(ref)
        # Relative-ish tolerance (kernel uses the EUP approximate reciprocal).
        err = float(jnp.max(jnp.abs(out - ref) / (1.0 + jnp.abs(ref))))
        assert math.isfinite(err) and err < 2e-2, err
        return out

    k1, k2, k3, k4 = jax.random.split(key, 4)
    # single time tile (auto tile collapses to T): B=2, n_fft=512, T=8, 1024 samples
    run(512, 8, 1024, None, k1, k2)
    # several time tiles exercising sequential overlap-add + store-first s=3 path
    run(512, 24, 3072, 8, k3, k4)
    print("KERNEL_OK")
</pallas_src>

<mosaic_0001>
module attributes {stable_mosaic.version = 11 : i64} {
  func.func @_ifft_ola_kernel(%arg0: i32, %arg1: i32, %arg2: memref<1x2x8x256xf32, #tpu.memory_space<vmem>>, %arg3: memref<512x512xbf16, #tpu.memory_space<vmem>>, %arg4: memref<16x128xf32, #tpu.memory_space<vmem>>, %arg5: memref<1xf32, #tpu.memory_space<smem>>, %arg6: memref<1x16x128xf32, #tpu.memory_space<vmem>>) attributes {dimension_semantics = [#tpu.dimension_semantics<parallel>, #tpu.dimension_semantics<arbitrary>], iteration_bounds = array<i64: 2, 1>, scalar_prefetch = 0 : i64, scratch_operands = 0 : i64, tpu.core_type = #tpu.core_type<tc>, window_params = [{transform_indices = @transform_0, window_bounds = array<i64: 1, 2, 8, 256>}, {pipeline_mode = #tpu.pipeline_mode<synchronous>, transform_indices = @transform_1, window_bounds = array<i64: 512, 512>}, {pipeline_mode = #tpu.pipeline_mode<synchronous>, transform_indices = @transform_2, window_bounds = array<i64: 16, 128>}, {transform_indices = @transform_3, window_bounds = array<i64: 1>}, {transform_indices = @transform_4, window_bounds = array<i64: 1, 16, 128>}]} {
    %c0_i32 = arith.constant 0 : i32
    %0 = arith.cmpi eq, %arg1, %c0_i32 : i32
    %1 = arith.extui %0 : i1 to i32
    %c0_i32_0 = arith.constant 0 : i32
    %2 = arith.cmpi ne, %1, %c0_i32_0 : i32
    scf.if %2 {
      %cst_44 = arith.constant 0.000000e+00 : f32
      %66 = vector.broadcast %cst_44 : f32 to vector<3x128xf32>
      %c0_45 = arith.constant 0 : index
      %c0_46 = arith.constant 0 : index
      %c0_47 = arith.constant 0 : index
      %67 = vector.load %arg6[%c0_45, %c0_46, %c0_47] : memref<1x16x128xf32, #tpu.memory_space<vmem>>, vector<1x3x128xf32>
      %68 = vector.shape_cast %67 : vector<1x3x128xf32> to vector<3x128xf32>
      %69 = vector.shape_cast %66 : vector<3x128xf32> to vector<1x3x128xf32>
      tpu.vector_store %arg6[%c0_45, %c0_46, %c0_47], %69 {strides = array<i32>} : memref<1x16x128xf32, #tpu.memory_space<vmem>>, vector<1x3x128xf32>,
      %cst_48 = arith.constant 0.000000e+00 : f32
      %70 = vector.broadcast %cst_48 : f32 to vector<5x128xf32>
      %c0_49 = arith.constant 0 : index
      %c11 = arith.constant 11 : index
      %c0_50 = arith.constant 0 : index
      %71 = vector.load %arg6[%c0_49, %c11, %c0_50] : memref<1x16x128xf32, #tpu.memory_space<vmem>>, vector<1x5x128xf32>
      %72 = vector.shape_cast %71 : vector<1x5x128xf32> to vector<5x128xf32>
      %73 = vector.shape_cast %70 : vector<5x128xf32> to vector<1x5x128xf32>
      tpu.vector_store %arg6[%c0_49, %c11, %c0_50], %73 {strides = array<i32>} : memref<1x16x128xf32, #tpu.memory_space<vmem>>, vector<1x5x128xf32>,
    } else {
    }
    %c0 = arith.constant 0 : index
    %c0_1 = arith.constant 0 : index
    %c0_2 = arith.constant 0 : index
    %c0_3 = arith.constant 0 : index
    %3 = vector.load %arg2[%c0, %c0_1, %c0_2, %c0_3] : memref<1x2x8x256xf32, #tpu.memory_space<vmem>>, vector<1x1x8x256xf32>
    %4 = vector.shape_cast %3 : vector<1x1x8x256xf32> to vector<8x256xf32>
    %5 = arith.truncf %4 : vector<8x256xf32> to vector<8x256xbf16>
    %c0_4 = arith.constant 0 : index
    %c1 = arith.constant 1 : index
    %c0_5 = arith.constant 0 : index
    %c0_6 = arith.constant 0 : index
    %6 = vector.load %arg2[%c0_4, %c1, %c0_5, %c0_6] : memref<1x2x8x256xf32, #tpu.memory_space<vmem>>, vector<1x1x8x256xf32>
    %7 = vector.shape_cast %6 : vector<1x1x8x256xf32> to vector<8x256xf32>
    %8 = arith.truncf %7 : vector<8x256xf32> to vector<8x256xbf16>
    %c8_i32 = arith.constant 8 : i32
    %9 = arith.muli %arg1, %c8_i32 : i32
    %10 = tpu.assume_multiple %9, 8 : i32
    %c0_7 = arith.constant 0 : index
    %c384 = arith.constant 384 : index
    %11 = vector.load %arg3[%c0_7, %c384] : memref<512x512xbf16, #tpu.memory_space<vmem>>, vector<256x128xbf16>
    %cst = arith.constant dense<0.000000e+00> : vector<8x128xf32>
    %12 = tpu.matmul %5, %11, %cst {dimension_numbers = #tpu.dot_dimension_numbers<[1], [0], [0], [1], [0, 0, 1, 1], [], []>} : vector<8x256xbf16>, vector<256x128xbf16>, vector<8x128xf32> -> vector<8x128xf32>
    %c256 = arith.constant 256 : index
    %c384_8 = arith.constant 384 : index
    %13 = vector.load %arg3[%c256, %c384_8] : memref<512x512xbf16, #tpu.memory_space<vmem>>, vector<256x128xbf16>
    %cst_9 = arith.constant dense<0.000000e+00> : vector<8x128xf32>
    %14 = tpu.matmul %8, %13, %cst_9 {dimension_numbers = #tpu.dot_dimension_numbers<[1], [0], [0], [1], [0, 0, 1, 1], [], []>} : vector<8x256xbf16>, vector<256x128xbf16>, vector<8x128xf32> -> vector<8x128xf32>
    %15 = arith.addf %12, %14 : vector<8x128xf32>
    %c3_i32 = arith.constant 3 : i32
    %16 = arith.addi %10, %c3_i32 : i32
    %c0_10 = arith.constant 0 : index
    %17 = arith.index_cast %16 : i32 to index
    %c0_11 = arith.constant 0 : index
    %18 = vector.load %arg6[%c0_10, %17, %c0_11] : memref<1x16x128xf32, #tpu.memory_space<vmem>>, vector<1x8x128xf32>
    %19 = vector.shape_cast %18 : vector<1x8x128xf32> to vector<8x128xf32>
    %20 = vector.shape_cast %15 : vector<8x128xf32> to vector<1x8x128xf32>
    tpu.vector_store %arg6[%c0_10, %17, %c0_11], %20 {strides = array<i32>} : memref<1x16x128xf32, #tpu.memory_space<vmem>>, vector<1x8x128xf32>,
    %c0_12 = arith.constant 0 : index
    %c0_13 = arith.constant 0 : index
    %21 = vector.load %arg3[%c0_12, %c0_13] : memref<512x512xbf16, #tpu.memory_space<vmem>>, vector<256x128xbf16>
    %cst_14 = arith.constant dense<0.000000e+00> : vector<8x128xf32>
    %22 = tpu.matmul %5, %21, %cst_14 {dimension_numbers = #tpu.dot_dimension_numbers<[1], [0], [0], [1], [0, 0, 1, 1], [], []>} : vector<8x256xbf16>, vector<256x128xbf16>, vector<8x128xf32> -> vector<8x128xf32>
    %c256_15 = arith.constant 256 : index
    %c0_16 = arith.constant 0 : index
    %23 = vector.load %arg3[%c256_15, %c0_16] : memref<512x512xbf16, #tpu.memory_space<vmem>>, vector<256x128xbf16>
    %cst_17 = arith.constant dense<0.000000e+00> : vector<8x128xf32>
    %24 = tpu.matmul %8, %23, %cst_17 {dimension_numbers = #tpu.dot_dimension_numbers<[1], [0], [0], [1], [0, 0, 1, 1], [], []>} : vector<8x256xbf16>, vector<256x128xbf16>, vector<8x128xf32> -> vector<8x128xf32>
    %25 = arith.addf %22, %24 : vector<8x128xf32>
    %c0_i32_18 = arith.constant 0 : i32
    %26 = arith.addi %10, %c0_i32_18 : i32
    %c0_19 = arith.constant 0 : index
    %27 = arith.index_cast %26 : i32 to index
    %c0_20 = arith.constant 0 : index
    %28 = vector.load %arg6[%c0_19, %27, %c0_20] : memref<1x16x128xf32, #tpu.memory_space<vmem>>, vector<1x8x128xf32>
    %29 = vector.shape_cast %28 : vector<1x8x128xf32> to vector<8x128xf32>
    %30 = arith.addf %29, %25 : vector<8x128xf32>
    %c0_21 = arith.constant 0 : index
    %31 = arith.index_cast %26 : i32 to index
    %c0_22 = arith.constant 0 : index
    %32 = vector.load %arg6[%c0_21, %31, %c0_22] : memref<1x16x128xf32, #tpu.memory_space<vmem>>, vector<1x8x128xf32>
    %33 = vector.shape_cast %32 : vector<1x8x128xf32> to vector<8x128xf32>
    %34 = vector.shape_cast %30 : vector<8x128xf32> to vector<1x8x128xf32>
    tpu.vector_store %arg6[%c0_21, %31, %c0_22], %34 {strides = array<i32>} : memref<1x16x128xf32, #tpu.memory_space<vmem>>, vector<1x8x128xf32>,
    %c0_23 = arith.constant 0 : index
    %c128 = arith.constant 128 : index
    %35 = vector.load %arg3[%c0_23, %c128] : memref<512x512xbf16, #tpu.memory_space<vmem>>, vector<256x128xbf16>
    %cst_24 = arith.constant dense<0.000000e+00> : vector<8x128xf32>
    %36 = tpu.matmul %5, %35, %cst_24 {dimension_numbers = #tpu.dot_dimension_numbers<[1], [0], [0], [1], [0, 0, 1, 1], [], []>} : vector<8x256xbf16>, vector<256x128xbf16>, vector<8x128xf32> -> vector<8x128xf32>
    %c256_25 = arith.constant 256 : index
    %c128_26 = arith.constant 128 : index
    %37 = vector.load %arg3[%c256_25, %c128_26] : memref<512x512xbf16, #tpu.memory_space<vmem>>, vector<256x128xbf16>
    %cst_27 = arith.constant dense<0.000000e+00> : vector<8x128xf32>
    %38 = tpu.matmul %8, %37, %cst_27 {dimension_numbers = #tpu.dot_dimension_numbers<[1], [0], [0], [1], [0, 0, 1, 1], [], []>} : vector<8x256xbf16>, vector<256x128xbf16>, vector<8x128xf32> -> vector<8x128xf32>
    %39 = arith.addf %36, %38 : vector<8x128xf32>
    %c1_i32 = arith.constant 1 : i32
    %40 = arith.addi %10, %c1_i32 : i32
    %c0_28 = arith.constant 0 : index
    %41 = arith.index_cast %40 : i32 to index
    %c0_29 = arith.constant 0 : index
    %42 = vector.load %arg6[%c0_28, %41, %c0_29] : memref<1x16x128xf32, #tpu.memory_space<vmem>>, vector<1x8x128xf32>
    %43 = vector.shape_cast %42 : vector<1x8x128xf32> to vector<8x128xf32>
    %44 = arith.addf %43, %39 : vector<8x128xf32>
    %c0_30 = arith.constant 0 : index
    %45 = arith.index_cast %40 : i32 to index
    %c0_31 = arith.constant 0 : index
    %46 = vector.load %arg6[%c0_30, %45, %c0_31] : memref<1x16x128xf32, #tpu.memory_space<vmem>>, vector<1x8x128xf32>
    %47 = vector.shape_cast %46 : vector<1x8x128xf32> to vector<8x128xf32>
    %48 = vector.shape_cast %44 : vector<8x128xf32> to vector<1x8x128xf32>
    tpu.vector_store %arg6[%c0_30, %45, %c0_31], %48 {strides = array<i32>} : memref<1x16x128xf32, #tpu.memory_space<vmem>>, vector<1x8x128xf32>,
    %c0_32 = arith.constant 0 : index
    %c256_33 = arith.constant 256 : index
    %49 = vector.load %arg3[%c0_32, %c256_33] : memref<512x512xbf16, #tpu.memory_space<vmem>>, vector<256x128xbf16>
    %cst_34 = arith.constant dense<0.000000e+00> : vector<8x128xf32>
    %50 = tpu.matmul %5, %49, %cst_34 {dimension_numbers = #tpu.dot_dimension_numbers<[1], [0], [0], [1], [0, 0, 1, 1], [], []>} : vector<8x256xbf16>, vector<256x128xbf16>, vector<8x128xf32> -> vector<8x128xf32>
    %c256_35 = arith.constant 256 : index
    %c256_36 = arith.constant 256 : index
    %51 = vector.load %arg3[%c256_35, %c256_36] : memref<512x512xbf16, #tpu.memory_space<vmem>>, vector<256x128xbf16>
    %cst_37 = arith.constant dense<0.000000e+00> : vector<8x128xf32>
    %52 = tpu.matmul %8, %51, %cst_37 {dimension_numbers = #tpu.dot_dimension_numbers<[1], [0], [0], [1], [0, 0, 1, 1], [], []>} : vector<8x256xbf16>, vector<256x128xbf16>, vector<8x128xf32> -> vector<8x128xf32>
    %53 = arith.addf %50, %52 : vector<8x128xf32>
    %c2_i32 = arith.constant 2 : i32
    %54 = arith.addi %10, %c2_i32 : i32
    %c0_38 = arith.constant 0 : index
    %55 = arith.index_cast %54 : i32 to index
    %c0_39 = arith.constant 0 : index
    %56 = vector.load %arg6[%c0_38, %55, %c0_39] : memref<1x16x128xf32, #tpu.memory_space<vmem>>, vector<1x8x128xf32>
    %57 = vector.shape_cast %56 : vector<1x8x128xf32> to vector<8x128xf32>
    %58 = arith.addf %57, %53 : vector<8x128xf32>
    %c0_40 = arith.constant 0 : index
    %59 = arith.index_cast %54 : i32 to index
    %c0_41 = arith.constant 0 : index
    %60 = vector.load %arg6[%c0_40, %59, %c0_41] : memref<1x16x128xf32, #tpu.memory_space<vmem>>, vector<1x8x128xf32>
    %61 = vector.shape_cast %60 : vector<1x8x128xf32> to vector<8x128xf32>
    %62 = vector.shape_cast %58 : vector<8x128xf32> to vector<1x8x128xf32>
    tpu.vector_store %arg6[%c0_40, %59, %c0_41], %62 {strides = array<i32>} : memref<1x16x128xf32, #tpu.memory_space<vmem>>, vector<1x8x128xf32>,
    %c0_i32_42 = arith.constant 0 : i32
    %63 = arith.cmpi eq, %arg1, %c0_i32_42 : i32
    %64 = arith.extui %63 : i1 to i32
    %c0_i32_43 = arith.constant 0 : i32
    %65 = arith.cmpi ne, %64, %c0_i32_43 : i32
    scf.if %65 {
      %c0_44 = arith.constant 0 : index
      %c0_45 = arith.constant 0 : index
      %66 = vector.load %arg4[%c0_44, %c0_45] : memref<16x128xf32, #tpu.memory_space<vmem>>, vector<16x128xf32>
      %cst_46 = arith.constant 1.000000e-07 : f32
      %67 = vector.broadcast %cst_46 : f32 to vector<16x128xf32>
      %68 = arith.addf %66, %67 : vector<16x128xf32>
      %69 = tpu.reciprocal %68 {approx = true} : vector<16x128xf32> -> vector<16x128xf32>
      %c0_47 = arith.constant 0 : index
      %c0_48 = arith.constant 0 : index
      %c0_49 = arith.constant 0 : index
      %70 = vector.load %arg6[%c0_47, %c0_48, %c0_49] : memref<1x16x128xf32, #tpu.memory_space<vmem>>, vector<1x16x128xf32>
      %71 = vector.shape_cast %70 : vector<1x16x128xf32> to vector<16x128xf32>
      %c0_50 = arith.constant 0 : index
      %72 = memref.load %arg5[%c0_50] : memref<1xf32, #tpu.memory_space<smem>>
      %73 = vector.broadcast %72 : f32 to vector<16x128xf32>
      %74 = arith.addf %71, %73 : vector<16x128xf32>
      %cst_51 = arith.constant 2.000000e+00 : f32
      %75 = vector.broadcast %cst_51 : f32 to vector<16x128xf32>
      %76 = arith.mulf %75, %74 : vector<16x128xf32>
      %77 = arith.mulf %76, %69 : vector<16x128xf32>
      %c0_52 = arith.constant 0 : index
      %c0_53 = arith.constant 0 : index
      %c0_54 = arith.constant 0 : index
      %78 = vector.load %arg6[%c0_52, %c0_53, %c0_54] : memref<1x16x128xf32, #tpu.memory_space<vmem>>, vector<1x16x128xf32>
      %79 = vector.shape_cast %78 : vector<1x16x128xf32> to vector<16x128xf32>
      %80 = vector.shape_cast %77 : vector<16x128xf32> to vector<1x16x128xf32>
      tpu.vector_store %arg6[%c0_52, %c0_53, %c0_54], %80 {strides = array<i32>} : memref<1x16x128xf32, #tpu.memory_space<vmem>>, vector<1x16x128xf32>,
    } else {
    }
    return
  }
  func.func @transform_0(%arg0: i32, %arg1: i32) -> (i32, i32, i32, i32) {
    %c0_i32 = arith.constant 0 : i32
    %c0_i32_0 = arith.constant 0 : i32
    %c0_i32_1 = arith.constant 0 : i32
    return %arg0, %c0_i32, %arg1, %c0_i32_0 : i32, i32, i32, i32
  }
  func.func @transform_1(%arg0: i32, %arg1: i32) -> (i32, i32) {
    %c0_i32 = arith.constant 0 : i32
    %c0_i32_0 = arith.constant 0 : i32
    %c0_i32_1 = arith.constant 0 : i32
    return %c0_i32, %c0_i32_0 : i32, i32
  }
  func.func @transform_2(%arg0: i32, %arg1: i32) -> (i32, i32) {
    %c0_i32 = arith.constant 0 : i32
    %c0_i32_0 = arith.constant 0 : i32
    %c0_i32_1 = arith.constant 0 : i32
    return %c0_i32, %c0_i32_0 : i32, i32
  }
  func.func @transform_3(%arg0: i32, %arg1: i32) -> i32 {
    %c0_i32 = arith.constant 0 : i32
    %c0_i32_0 = arith.constant 0 : i32
    return %c0_i32 : i32
  }
  func.func @transform_4(%arg0: i32, %arg1: i32) -> (i32, i32, i32) {
    %c0_i32 = arith.constant 0 : i32
    %c0_i32_0 = arith.constant 0 : i32
    %c0_i32_1 = arith.constant 0 : i32
    return %arg0, %c0_i32, %c0_i32_0 : i32, i32, i32
  }
}

</mosaic_0001>

<bundles_post_ra>
// kernel: tpu_custom_call.1
= control target key start
LH: loop header
LB: loop body
LE: loop exit
PB: predicated region body
PF: predicated region fallthrough
CT: control target
= control target key end

     0   :  { %s2860_s0 = inlined_call_operand.hbm [shape: f32[2,2,8,256], index: 0, kind: input, shape index: {}]   ;;  %s2861_s1 = inlined_call_operand.hbm [shape: bf16[512,512], index: 1, kind: input, shape index: {}]   ;;  %s2862_s2 = inlined_call_operand.hbm [shape: f32[16,128], index: 2, kind: input, shape index: {}]   ;;  %s2863_s3 = inlined_call_operand.<no memory space> [shape: f32[1], index: 3, kind: input, shape index: {}]   ;;  %s2864_s4 = inlined_call_operand.hbm [shape: f32[2,16,128], index: 4, kind: output, shape index: {}]  }
   0x1   :  { %9 = sst [smem:[#allocation2]] %s2863_s3 }
   0x2   :  { %10 = vsyncpa [#allocation4], 0 }
   0x3   :  { %12 = vsyncpa [#allocation4 + $0x1], 0 }
   0x4   :  { %13 = vsyncpa [#allocation7], 0 }
   0x5   :  { %14 = vsyncpa [#allocation5], 0 }
   0x6   :  { %16 = vsyncpa [#allocation5 + $0x1], 0  ;;  %s2661_s17 = smov 0   ;;  %s2663_s18 = smov 0  }
   0x7   :  { %s2665_s19 = smov 0   ;;  %s2667_s20 = smov 0  }
   0x8   :  { %s2669_s21 = smov 0   ;;  %s2671_s22 = smov 0  }
   0x9 LB: > { %s1684_s3 = sadd.s32 4294967295, %s2622_s22   ;;  %s1685_s23 = sadd.s32 4294967294, %s2622_s22   ;;  %s2622_s22 = sphi %s2671_s22, %s22_s22   ;;  %s2618_s21 = sphi %s2669_s21, %s2874_s21   ;;  %s2614_s20 = sphi %s2667_s20, %s2873_s20   ;;  %s2610_s19 = sphi %s2665_s19, %s2872_s19   ;;  %s2606_s18 = sphi %s2663_s18, %s2871_s18   ;;  %s2602_s17 = sphi %s2661_s17, %s2870_s17  }
   0xa   : > { %p56_p0 = scmp.ne.s32.totalorder %s2606_s18, %s2602_s17  ;;  %p2697_p1 = scmp.eq.s32.totalorder %s1684_s3, 0 }
   0xb   : > { %p149_p2 = scmp.eq.s32.totalorder %s1685_s23, 1  ;;  %p1686_p4 = scmp.ge.s32.totalorder %s2622_s22, 1 }
   0xc   : > { %p2703_p3 = por %p2697_p1, %p56_p0  ;;  %p156_p6 = scmp.lt.s32.totalorder %s2622_s22, 3 }
   0xd   : > { %p2708_p5 = por %p149_p2, %p56_p0  ;;  %s167_s29 = sshll.u32 %s2861_s1, 4  ;;  %s168_s29 = int_to_ptr.hbm [resolvable:$true] %s167_s29 }
   0xe   : > { %p2716_p7 = pnand %p1686_p4, %p156_p6  ;;  %s2624_s5 = smov [#allocation6]  }
   0xf   : > { %s169_s6 = sshll.u32 %s2624_s5, 4  ;;  %p1689_p10 = scmp.ge.s32.totalorder %s2622_s22, 2  ;;  %s170_s6 = int_to_ptr.vmem [resolvable:$true] %s169_s6 }
  0x10   : > { %p2364_p8 = pneg %p2716_p7  ;;  %s181_s9 = sshll.u32 %s2862_s2, 4  ;;  %s182_s9 = int_to_ptr.hbm [resolvable:$true] %s181_s9 }
  0x11   : > { %s2625_s10 = smov 256   ;;  %s2626_s11 = smov 16  }
  0x12   : > { %p2365_p9 = pnand %p2364_p8, %p2697_p1  ;;  %s2627_s12 = smov [#allocation8]  }
  0x13   : > { %s183_s13 = sshll.u32 %s2627_s12, 4  ;;  %s2628_s14 = smov 128   ;;  %s184_s13 = int_to_ptr.vmem [resolvable:$true] %s183_s13 }
  0x14   : > { %2367 = dma.hbm_to_vmem [thread:$0]  (!%p2365_p9), %s168_s29, 16384, %s170_s6, [#allocation7], %s2625_s10, %s2625_s10, %s2626_s11  }
  0x15   : > { %s2629_s15 = smov 8   ;;  %p143_p11 = scmp.eq.s32.totalorder %s1684_s3, 1 }
  0x16   : > { %2370 = dma.hbm_to_vmem [thread:$0]  (!%p2365_p9), %s182_s9, 256, %s184_s13, [#allocation7], %s2628_s14, %s2628_s14, %s2629_s15  }
  0x17   : > { %s34_s16 = sadd.s32 1, %s2618_s21  ;;  %s43_s23 = sadd.s32 1, %s2610_s19 }
  0x18   : > { %p36_p12 = scmp.ge.s32.totalorder %s34_s16, 2  ;;  %p50_p13 = scmp.ne.s32.totalorder %s2610_s19, %s2606_s18 }
  0x19   : > { %p51_p0 = scmp.eq.s32.totalorder %s2622_s22, 0  ;;  %p2381_p4 = scmp.lt.s32.totalorder %s2622_s22, 2 }
  0x1a   : > { %s2876_s16 = smov (%p36_p12, %s34_s16), 0  ;;  %p2740_p2 = por %p143_p11, %p50_p13 }
  0x1b   : > { %s38_s28 = ssub.s32 %s2618_s21, %s2876_s16  ;;  %s200_s29 = sand.u32 1, %s2610_s19  }
  0x1c   : > { %p41_p6 = scmp.eq.s32.totalorder %s38_s28, 0  ;;  %p52_p8 = por %p51_p0, %p50_p13 }
  0x1d   : > { %s1690_s5 = sshll.u32 %s200_s29, 5  ;;  %s2222_s3 = sshll.u32 %s2618_s21, 5 }
  0x1e   : > { %s2750_s6 = scalar_select %p41_p6, %s2610_s19, %s43_s23  }
  0x1f   : > { %s211_s9 = scalar_lea.hbm %s2860_s0, %s2222_s3  ;;  %s204_s13 = scalar_lea.vmem [#allocation3], %s1690_s5 }
  0x20   : > { %s212_s12 = sshll.u32 %s211_s9, 4  ;;  %s214_s14 = sshll.u32 %s204_s13, 4  ;;  %s213_s12 = int_to_ptr.hbm [resolvable:$true] %s212_s12  ;;  %s215_s14 = int_to_ptr.vmem [resolvable:$true] %s214_s14 }
  0x21   : > { %p2372_p9 = pnand %p2381_p4, %p52_p8  ;;  %s201_s15 = scalar_lea.sflag [#allocation4], %s200_s29 }
  0x22   : > { %226 = sbr.rel (%p2716_p7) target bundleno = 331 (0x14b), region = 36  ;;  %s2763_s23 = sand.u32 (!%p2716_p7), 1, %s2606_s18  }
  0x23   : > { %2374 = dma.hbm_to_vmem [thread:$0]  (!%p2372_p9), %s213_s12, 512, %s215_s14, %s201_s15, %s2625_s10, %s2625_s10, %s2626_s11  }
  0x24   : > { %s1694_s28 = sshll.u32 (!%p2716_p7), %s2763_s23, 5  ;;  %s229_s5 = scalar_lea.sflag (!%p2716_p7), [#allocation4], %s2763_s23 }
  0x25   : > { %s2767_s3 = scalar_lea.vmem (!%p2716_p7), [#allocation3], %s1694_s28 }
  0x27   : > { %2589 = dma.done.wait (%p2703_p3), %s229_s5, 512  }
  0x28   : > { %2591 = vsyncadd (%p2703_p3), %s229_s5, 4294966784 }
  0x29   : > { %2593 = dma.done.wait (%p2697_p1), [#allocation7], 16640  }
  0x2a   : > { %2595 = vsyncadd (%p2697_p1), [#allocation7], 4294950656  ;;  %v1730_v0 = vld [vmem:[#allocation6 + $0x2ec] sm:$0xf]  ;;  %v2246_v1 = vld [vmem:[#allocation6 + $0x2f8] sm:$0xf0] }
  0x2b   : > { %v1762_v2 = vld [vmem:[#allocation6 + $0x3ec] sm:$0xf]  ;;  %v1731_v3 = vor.u32 %v2246_v1, %v1730_v0  ;;  %v2254_v4 = vld [vmem:[#allocation6 + $0x3f8] sm:$0xf0]  ;;  %s1697_s24 = sshll.u32 %s2763_s23, 4  ;;  %s1544_s30 = sld [smem:[#allocation2]] }
  0x2c   : > { %v1794_v5 = vld [vmem:[#allocation6 + $0xec] sm:$0xf]  ;;  %v2230_v6 = vld [vmem:[#allocation6 + $0xf8] sm:$0xf0]  ;;  %v1763_v7 = vor.u32 %v2254_v4, %v1762_v2  ;;  %s2806_s25 = scalar_lea.vmem [#allocation9], %s1697_s24  ;;  %s2351_s10 = sshll.u32 %s2614_s20, 4 }
  0x2d   : > { %v1795_v8 = vor.u32 %v2230_v6, %v1794_v5  ;;  %v1826_v9 = vld [vmem:[#allocation6 + $0x1ec] sm:$0xf]  ;;  %v2238_v10 = vld [vmem:[#allocation6 + $0x1f8] sm:$0xf0]  ;;  %444 = vmatpush.bf16.msra.mxu0 %v1731_v3  ;;  %s1566_s7 = scalar_lea.hbm %s2864_s4, %s2351_s10  ;;  %s1567_s8 = sshll.u32 %s2806_s25, 4  ;;  %s1568_s8 = int_to_ptr.vmem [resolvable:$true] %s1567_s8 }
  0x2e   : > { %v1726_v11 = vld [vmem:[#allocation6 + $0x2cc] sm:$0xf]  ;;  %v1827_v12 = vor.u32 %v2238_v10, %v1826_v9  ;;  %v2245_v13 = vld [vmem:[#allocation6 + $0x2d8] sm:$0xf0]  ;;  %457 = vmatpush.bf16.msra.mxu1 %v1763_v7  ;;  %s1569_s9 = sshll.u32 %s1566_s7, 4  ;;  %s1555_s20 = scalar_lea.sflag [#allocation5], %s2763_s23  ;;  %s1570_s9 = int_to_ptr.hbm [resolvable:$true] %s1569_s9 }
  0x2f   : > { %v1758_v14 = vld [vmem:[#allocation6 + $0x3cc] sm:$0xf]  ;;  %v2253_v15 = vld [vmem:[#allocation6 + $0x3d8] sm:$0xf0]  ;;  %566 = vmatpush.bf16.msra.mxu2 %v1795_v8  ;;  %v1727_v16 = vor.u32 %v2245_v13, %v1726_v11  ;;  %s2550_s12 = sshra.s32 %s1570_s9, 4  ;;  %s2556_s28 = scalar_lea.hbm %s2864_s4, 32  ;;  %s2551_s12 = int_to_ptr.hbm [resolvable:$true] %s2550_s12 }
  0x30   : > { %v1759_v17 = vor.u32 %v2253_v15, %v1758_v14  ;;  %v1790_v18 = vld [vmem:[#allocation6 + $0xcc] sm:$0xf]  ;;  %v2229_v19 = vld [vmem:[#allocation6 + $0xd8] sm:$0xf0]  ;;  %579 = vmatpush.bf16.msra.mxu3 %v1827_v12  ;;  %s2552_s13 = scalar_lea.hbm %s2551_s12, 16  ;;  %p2557_p11 = scmp.lt.s32.totalorder %s2551_s12, %s2864_s4 }
  0x31   : > { %v1822_v20 = vld [vmem:[#allocation6 + $0x1cc] sm:$0xf]  ;;  %v1791_v21 = vor.u32 %v2229_v19, %v1790_v18  ;;  %v2237_v22 = vld [vmem:[#allocation6 + $0x1d8] sm:$0xf0]  ;;  %445 = vmatpush.bf16.msra.mxu0 %v1727_v16  ;;  %p2553_p1 = scmp.ne.s32.totalorder %s2551_s12, %s2552_s13  ;;  %p2558_p12 = scmp.lt.s32.totalorder %s2556_s28, %s2552_s13 }
  0x32   : > { %v1722_v23 = vld [vmem:[#allocation6 + $0x2ac] sm:$0xf]  ;;  %v2244_v24 = vld [vmem:[#allocation6 + $0x2b8] sm:$0xf0]  ;;  %v1823_v25 = vor.u32 %v2237_v22, %v1822_v20  ;;  %458 = vmatpush.bf16.msra.mxu1 %v1759_v17 }
  0x33   : > { %v1754_v26 = vld [vmem:[#allocation6 + $0x3ac] sm:$0xf]  ;;  %v2252_v27 = vld [vmem:[#allocation6 + $0x3b8] sm:$0xf0]  ;;  %v1723_v29 = vor.u32 %v2244_v24, %v1722_v23  ;;  %567 = vmatpush.bf16.msra.mxu2 %v1791_v21  ;;  %p2554_p3 = pnand %p2553_p1, %p2740_p2  ;;  %p2559_p13 = por %p2558_p12, %p2557_p11 }
  0x34   : > { %v1786_v28 = vld [vmem:[#allocation6 + $0xac] sm:$0xf]  ;;  %v2228_v30 = vld [vmem:[#allocation6 + $0xb8] sm:$0xf0]  ;;  %v1755_v33 = vor.u32 %v2252_v27, %v1754_v26  ;;  %580 = vmatpush.bf16.msra.mxu3 %v1823_v25 }
  0x35   : > { %v1818_v31 = vld [vmem:[#allocation6 + $0x1ac] sm:$0xf]  ;;  %v2236_v32 = vld [vmem:[#allocation6 + $0x1b8] sm:$0xf0]  ;;  %v1787_v34 = vor.u32 %v2228_v30, %v1786_v28  ;;  %446 = vmatpush.bf16.msra.mxu0 %v1723_v29  ;;  %v1859_v28 = vld [vmem:[#allocation6 + $0x2e0] sm:$0xf]  ;;  %p2555_p7 = pneg %p2554_p3 }
  0x36   : > { %v1718_v35 = vld [vmem:[#allocation6 + $0x28c] sm:$0xf]  ;;  %v2243_v36 = vld [vmem:[#allocation6 + $0x298] sm:$0xf0]  ;;  %v1819_v38 = vor.u32 %v2236_v32, %v1818_v31  ;;  %459 = vmatpush.bf16.msra.mxu1 %v1755_v33  ;;  %v2278_v29 = vld [vmem:[#allocation6 + $0x2ec] sm:$0xf0] }
  0x37   : > { %v1750_v37 = vld [vmem:[#allocation6 + $0x38c] sm:$0xf]  ;;  %v2251_v39 = vld [vmem:[#allocation6 + $0x398] sm:$0xf0]  ;;  %v1719_v44 = vor.u32 %v2243_v36, %v1718_v35  ;;  %568 = vmatpush.bf16.msra.mxu2 %v1787_v34  ;;  %v1891_v30 = vld [vmem:[#allocation6 + $0x3e0] sm:$0xf]  ;;  %p2560_p0 = pnand %p2559_p13, %p2555_p7 }
  0x38   : > { %v1782_v40 = vld [vmem:[#allocation6 + $0x8c] sm:$0xf]  ;;  %v2227_v41 = vld [vmem:[#allocation6 + $0x98] sm:$0xf0]  ;;  %v1751_v45 = vor.u32 %v2251_v39, %v1750_v37  ;;  %581 = vmatpush.bf16.msra.mxu3 %v1819_v38  ;;  %v2286_v32 = vld [vmem:[#allocation6 + $0x3ec] sm:$0xf0] }
  0x39   : > { %v1814_v42 = vld [vmem:[#allocation6 + $0x18c] sm:$0xf]  ;;  %v2235_v43 = vld [vmem:[#allocation6 + $0x198] sm:$0xf0]  ;;  %v1783_v46 = vor.u32 %v2227_v41, %v1782_v40  ;;  %447 = vmatpush.bf16.msra.mxu0 %v1719_v44  ;;  %v1923_v33 = vld [vmem:[#allocation6 + $0xe0] sm:$0xf]  ;;  %v1860_v40 = vor.u32 %v2278_v29, %v1859_v28  ;;  %v1892_v41 = vor.u32 %v2286_v32, %v1891_v30 }
  0x3a   : > { %v1714_v47 = vld [vmem:[#allocation6 + $0x26c] sm:$0xf]  ;;  %v2242_v48 = vld [vmem:[#allocation6 + $0x278] sm:$0xf0]  ;;  %v1815_v50 = vor.u32 %v2235_v43, %v1814_v42  ;;  %460 = vmatpush.bf16.msra.mxu1 %v1751_v45  ;;  %v2262_v34 = vld [vmem:[#allocation6 + $0xec] sm:$0xf0] }
  0x3b   : > { %v1746_v49 = vld [vmem:[#allocation6 + $0x36c] sm:$0xf]  ;;  %v2250_v51 = vld [vmem:[#allocation6 + $0x378] sm:$0xf0]  ;;  %v1715_v56 = vor.u32 %v2242_v48, %v1714_v47  ;;  %569 = vmatpush.bf16.msra.mxu2 %v1783_v46  ;;  %v1955_v37 = vld [vmem:[#allocation6 + $0x1e0] sm:$0xf]  ;;  %v1924_v42 = vor.u32 %v2262_v34, %v1923_v33 }
  0x3c   : > { %v1778_v52 = vld [vmem:[#allocation6 + $0x6c] sm:$0xf]  ;;  %v2226_v53 = vld [vmem:[#allocation6 + $0x78] sm:$0xf0]  ;;  %v1747_v57 = vor.u32 %v2250_v51, %v1746_v49  ;;  %582 = vmatpush.bf16.msra.mxu3 %v1815_v50  ;;  %v2270_v38 = vld [vmem:[#allocation6 + $0x1ec] sm:$0xf0] }
  0x3d   : > { %v1810_v54 = vld [vmem:[#allocation6 + $0x16c] sm:$0xf]  ;;  %v2234_v55 = vld [vmem:[#allocation6 + $0x178] sm:$0xf0]  ;;  %v1779_v58 = vor.u32 %v2226_v53, %v1778_v52  ;;  %448 = vmatpush.bf16.msra.mxu0 %v1715_v56  ;;  %v1855_v43 = vld [vmem:[#allocation6 + $0x2c0] sm:$0xf]  ;;  %v1956_v46 = vor.u32 %v2270_v38, %v1955_v37 }
  0x3e   : > { %v1710_v59 = vld [vmem:[#allocation6 + $0x24c] sm:$0xf]  ;;  %v2241_v60 = vld [vmem:[#allocation6 + $0x258] sm:$0xf0]  ;;  %v1811_v62 = vor.u32 %v2234_v55, %v1810_v54  ;;  %461 = vmatpush.bf16.msra.mxu1 %v1747_v57  ;;  %v2277_v44 = vld [vmem:[#allocation6 + $0x2cc] sm:$0xf0] }
  0x3f   : > { %v1742_v61 = vld [vmem:[#allocation6 + $0x34c] sm:$0xf]  ;;  %v2249_v63 = vld [vmem:[#allocation6 + $0x358] sm:$0xf0]  ;;  %v1711_v4 = vor.u32 %v2241_v60, %v1710_v59  ;;  %570 = vmatpush.bf16.msra.mxu2 %v1779_v58  ;;  %v1887_v45 = vld [vmem:[#allocation6 + $0x3c0] sm:$0xf]  ;;  %v1856_v53 = vor.u32 %v2277_v44, %v1855_v43 }
  0x40   : > { %v1774_v0 = vld [vmem:[#allocation6 + $0x4c] sm:$0xf]  ;;  %v2225_v1 = vld [vmem:[#allocation6 + $0x58] sm:$0xf0]  ;;  %v1743_v5 = vor.u32 %v2249_v63, %v1742_v61  ;;  %583 = vmatpush.bf16.msra.mxu3 %v1811_v62  ;;  %v2285_v47 = vld [vmem:[#allocation6 + $0x3cc] sm:$0xf0] }
  0x41   : > { %v1806_v2 = vld [vmem:[#allocation6 + $0x14c] sm:$0xf]  ;;  %v2233_v3 = vld [vmem:[#allocation6 + $0x158] sm:$0xf0]  ;;  %v1775_v6 = vor.u32 %v2225_v1, %v1774_v0  ;;  %449 = vmatpush.bf16.msra.mxu0 %v1711_v4  ;;  %v1919_v48 = vld [vmem:[#allocation6 + $0xc0] sm:$0xf]  ;;  %v1888_v58 = vor.u32 %v2285_v47, %v1887_v45 }
  0x42   : > { %v1706_v7 = vld [vmem:[#allocation6 + $0x22c] sm:$0xf]  ;;  %v2240_v8 = vld [vmem:[#allocation6 + $0x238] sm:$0xf0]  ;;  %v1807_v10 = vor.u32 %v2233_v3, %v1806_v2  ;;  %462 = vmatpush.bf16.msra.mxu1 %v1743_v5  ;;  %v2261_v49 = vld [vmem:[#allocation6 + $0xcc] sm:$0xf0] }
  0x43   : > { %v1738_v9 = vld [vmem:[#allocation6 + $0x32c] sm:$0xf]  ;;  %v2248_v11 = vld [vmem:[#allocation6 + $0x338] sm:$0xf0]  ;;  %v1707_v16 = vor.u32 %v2240_v8, %v1706_v7  ;;  %571 = vmatpush.bf16.msra.mxu2 %v1775_v6  ;;  %v1951_v50 = vld [vmem:[#allocation6 + $0x1c0] sm:$0xf]  ;;  %v1920_v59 = vor.u32 %v2261_v49, %v1919_v48 }
  0x44   : > { %v1770_v12 = vld [vmem:[#allocation6 + $0x2c] sm:$0xf]  ;;  %v2224_v13 = vld [vmem:[#allocation6 + $0x38] sm:$0xf0]  ;;  %v1739_v19 = vor.u32 %v2248_v11, %v1738_v9  ;;  %584 = vmatpush.bf16.msra.mxu3 %v1807_v10  ;;  %v2269_v51 = vld [vmem:[#allocation6 + $0x1cc] sm:$0xf0] }
  0x45   : > { %v1802_v14 = vld [vmem:[#allocation6 + $0x12c] sm:$0xf]  ;;  %v2232_v15 = vld [vmem:[#allocation6 + $0x138] sm:$0xf0]  ;;  %v1771_v20 = vor.u32 %v2224_v13, %v1770_v12  ;;  %450 = vmatpush.bf16.msra.mxu0 %v1707_v16  ;;  %v274_v52 = vld [vmem:[%s2767_s3] sm:$0xff]  ;;  %v1952_v63 = vor.u32 %v2269_v51, %v1951_v50 }
  0x46   : > { %v1702_v17 = vld [vmem:[#allocation6 + $0x20c] sm:$0xf]  ;;  %v2239_v18 = vld [vmem:[#allocation6 + $0x218] sm:$0xf0]  ;;  %v1803_v24 = vor.u32 %v2232_v15, %v1802_v14  ;;  %463 = vmatpush.bf16.msra.mxu1 %v1739_v19  ;;  %v1851_v54 = vld [vmem:[#allocation6 + $0x2a0] sm:$0xf]  ;;  %v2778_v57 = vpack.c.bf16 %v274_v52, %v274_v52 }
  0x47   : > { %v1734_v21 = vld [vmem:[#allocation6 + $0x30c] sm:$0xf]  ;;  %v2247_v22 = vld [vmem:[#allocation6 + $0x318] sm:$0xf0]  ;;  %v1703_v31 = vor.u32 %v2239_v18, %v1702_v17  ;;  %572 = vmatpush.bf16.msra.mxu2 %v1771_v20  ;;  %v2276_v55 = vld [vmem:[#allocation6 + $0x2ac] sm:$0xf0] }
  0x48   : > { %v1766_v23 = vld [vmem:[#allocation6 + $0xc] sm:$0xf]  ;;  %v2223_v25 = vld [vmem:[#allocation6 + $0x18] sm:$0xf0]  ;;  %v1735_v35 = vor.u32 %v2247_v22, %v1734_v21  ;;  %585 = vmatpush.bf16.msra.mxu3 %v1803_v24  ;;  %v1883_v56 = vld [vmem:[#allocation6 + $0x3a0] sm:$0xf]  ;;  %v1852_v8 = vor.u32 %v2276_v55, %v1851_v54 }
  0x49   : > { %v1798_v26 = vld [vmem:[#allocation6 + $0x10c] sm:$0xf]  ;;  %v2231_v27 = vld [vmem:[#allocation6 + $0x118] sm:$0xf0]  ;;  %v1767_v36 = vor.u32 %v2223_v25, %v1766_v23  ;;  %451 = vmatpush.bf16.msra.mxu0 %v1703_v31  ;;  %v2284_v60 = vld [vmem:[#allocation6 + $0x3ac] sm:$0xf0] }
  0x4a   : > { %v1799_v39 = vor.u32 %v2231_v27, %v1798_v26  ;;  %464 = vmatpush.bf16.msra.mxu1 %v1735_v35  ;;  %v1915_v61 = vld [vmem:[#allocation6 + $0xa0] sm:$0xf]  ;;  %v2260_v62 = vld [vmem:[#allocation6 + $0xac] sm:$0xf0]  ;;  %v275_v0 = vld [vmem:[%s2767_s3 + $0x8] sm:$0xff]  ;;  %v1884_v9 = vor.u32 %v2284_v60, %v1883_v56 }
  0x4b   : > { %573 = vmatpush.bf16.msra.mxu2 %v1767_v36  ;;  %v1698_v1 = vld [vmem:[%s2767_s3 + $0x10] sm:$0xff]  ;;  %v1699_v2 = vld [vmem:[%s2767_s3 + $0x18] sm:$0xff]  ;;  %v1947_v3 = vld [vmem:[#allocation6 + $0x1a0] sm:$0xf]  ;;  %v2784_v5 = vpack.c.bf16 %v275_v0, %v275_v0  ;;  %v1916_v10 = vor.u32 %v2260_v62, %v1915_v61 }
  0x4c   : > { %586 = vmatpush.bf16.msra.mxu3 %v1799_v39  ;;  %v2268_v4 = vld [vmem:[#allocation6 + $0x1ac] sm:$0xf0]  ;;  %v2786_v6 = vpack.c.bf16 %v1698_v1, %v1698_v1  ;;  %v2788_v7 = vpack.c.bf16 %v1699_v2, %v1699_v2  ;;  %v1847_v11 = vld [vmem:[#allocation6 + $0x280] sm:$0xf] }
  0x4d   : > { %755 = vmatpush.bf16.msrb.mxu0 %v1860_v40  ;;  %v2275_v12 = vld [vmem:[#allocation6 + $0x28c] sm:$0xf0]  ;;  %v1879_v13 = vld [vmem:[#allocation6 + $0x380] sm:$0xf]  ;;  %v1948_v14 = vor.u32 %v2268_v4, %v1947_v3 }
  0x4e   : > { %768 = vmatpush.bf16.msrb.mxu1 %v1892_v41  ;;  %574 = vmatmul.bf16.vlgmr.msra.gmra.mxu2 %v2778_v57  ;;  %v2283_v15 = vld [vmem:[#allocation6 + $0x38c] sm:$0xf0]  ;;  %v1911_v16 = vld [vmem:[#allocation6 + $0x80] sm:$0xf]  ;;  %v1848_v20 = vor.u32 %v2275_v12, %v1847_v11  ;;  %v2318_v12 = vld [vmem:[#allocation6 + $0x3f0] sm:$0xf0] }
  0x4f   : > { %877 = vmatpush.bf16.msrb.mxu2 %v1924_v42  ;;  %v2259_v17 = vld [vmem:[#allocation6 + $0x8c] sm:$0xf0]  ;;  %452 = vmatmul.bf16.vlgmr.msra.gmra.mxu0 %v2786_v6  ;;  %v1943_v18 = vld [vmem:[#allocation6 + $0x180] sm:$0xf]  ;;  %v1880_v21 = vor.u32 %v2283_v15, %v1879_v13  ;;  %v2051_v13 = vld [vmem:[#allocation6 + $0xe4] sm:$0xf] }
  0x50   : > { %890 = vmatpush.bf16.msrb.mxu3 %v1956_v46  ;;  %v2267_v19 = vld [vmem:[#allocation6 + $0x18c] sm:$0xf0]  ;;  %465 = vmatmul.bf16.vlgmr.msra.gmra.mxu1 %v2788_v7  ;;  %v1912_v22 = vor.u32 %v2259_v17, %v1911_v16  ;;  %v1843_v23 = vld [vmem:[#allocation6 + $0x260] sm:$0xf]  ;;  %v2083_v17 = vld [vmem:[#allocation6 + $0x1e4] sm:$0xf] }
  0x51   : > { %756 = vmatpush.bf16.msrb.mxu0 %v1856_v53  ;;  %587 = vmatmul.bf16.vlgmr.msra.gmra.mxu3 %v2784_v5  ;;  %v2274_v24 = vld [vmem:[#allocation6 + $0x26c] sm:$0xf0]  ;;  %v1875_v25 = vld [vmem:[#allocation6 + $0x360] sm:$0xf]  ;;  %v1944_v26 = vor.u32 %v2267_v19, %v1943_v18  ;;  %v2302_v18 = vld [vmem:[#allocation6 + $0x1f0] sm:$0xf0] }
  0x52   : > { %769 = vmatpush.bf16.msrb.mxu1 %v1888_v58  ;;  %v2282_v27 = vld [vmem:[#allocation6 + $0x36c] sm:$0xf0]  ;;  %v1907_v28 = vld [vmem:[#allocation6 + $0x60] sm:$0xf]  ;;  %v1844_v32 = vor.u32 %v2274_v24, %v1843_v23  ;;  %v1983_v23 = vld [vmem:[#allocation6 + $0x2c4] sm:$0xf] }
  0x53   : > { %878 = vmatpush.bf16.msrb.mxu2 %v1920_v59  ;;  %v2258_v29 = vld [vmem:[#allocation6 + $0x6c] sm:$0xf0]  ;;  %v1939_v30 = vld [vmem:[#allocation6 + $0x160] sm:$0xf]  ;;  %v1876_v33 = vor.u32 %v2282_v27, %v1875_v25  ;;  %v2309_v24 = vld [vmem:[#allocation6 + $0x2d0] sm:$0xf0] }
  0x54   : > { %891 = vmatpush.bf16.msrb.mxu3 %v1952_v63  ;;  %v2266_v31 = vld [vmem:[#allocation6 + $0x16c] sm:$0xf0]  ;;  %v1908_v34 = vor.u32 %v2258_v29, %v1907_v28  ;;  %v1839_v35 = vld [vmem:[#allocation6 + $0x240] sm:$0xf]  ;;  %v2015_v25 = vld [vmem:[#allocation6 + $0x3c4] sm:$0xf] }
  0x55   : > { %757 = vmatpush.bf16.msrb.mxu0 %v1852_v8  ;;  %v2273_v36 = vld [vmem:[#allocation6 + $0x24c] sm:$0xf0]  ;;  %v1871_v37 = vld [vmem:[#allocation6 + $0x340] sm:$0xf]  ;;  %v1940_v38 = vor.u32 %v2266_v31, %v1939_v30  ;;  %v1987_v8 = vld [vmem:[#allocation6 + $0x2e4] sm:$0xf] }
  0x56   : > { %770 = vmatpush.bf16.msrb.mxu1 %v1884_v9  ;;  %v2281_v39 = vld [vmem:[#allocation6 + $0x34c] sm:$0xf0]  ;;  %v1903_v40 = vld [vmem:[#allocation6 + $0x40] sm:$0xf]  ;;  %v1840_v44 = vor.u32 %v2273_v36, %v1839_v35  ;;  %v2310_v9 = vld [vmem:[#allocation6 + $0x2f0] sm:$0xf0] }
  0x57   : > { %879 = vmatpush.bf16.msrb.mxu2 %v1916_v10  ;;  %v2257_v41 = vld [vmem:[#allocation6 + $0x4c] sm:$0xf0]  ;;  %v1935_v42 = vld [vmem:[#allocation6 + $0x140] sm:$0xf]  ;;  %v1872_v45 = vor.u32 %v2281_v39, %v1871_v37  ;;  %v2019_v10 = vld [vmem:[#allocation6 + $0x3e4] sm:$0xf] }
  0x58   : > { %892 = vmatpush.bf16.msrb.mxu3 %v1948_v14  ;;  %v2265_v43 = vld [vmem:[#allocation6 + $0x14c] sm:$0xf0]  ;;  %v1904_v46 = vor.u32 %v2257_v41, %v1903_v40  ;;  %v1835_v47 = vld [vmem:[#allocation6 + $0x220] sm:$0xf]  ;;  %v2294_v14 = vld [vmem:[#allocation6 + $0xf0] sm:$0xf0] }
  0x59   : > { %758 = vmatpush.bf16.msrb.mxu0 %v1848_v20  ;;  %v2272_v48 = vld [vmem:[#allocation6 + $0x22c] sm:$0xf0]  ;;  %v1867_v49 = vld [vmem:[#allocation6 + $0x320] sm:$0xf]  ;;  %v1936_v50 = vor.u32 %v2265_v43, %v1935_v42  ;;  %v1988_v20 = vor.u32 %v2310_v9, %v1987_v8  ;;  %v2317_v27 = vld [vmem:[#allocation6 + $0x3d0] sm:$0xf0] }
  0x5a   : > { %771 = vmatpush.bf16.msrb.mxu1 %v1880_v21  ;;  %v2280_v51 = vld [vmem:[#allocation6 + $0x32c] sm:$0xf0]  ;;  %v1899_v52 = vld [vmem:[#allocation6 + $0x20] sm:$0xf]  ;;  %v1836_v56 = vor.u32 %v2272_v48, %v1835_v47  ;;  %v2020_v21 = vor.u32 %v2318_v12, %v2019_v10  ;;  %v2047_v28 = vld [vmem:[#allocation6 + $0xc4] sm:$0xf] }
  0x5b   : > { %880 = vmatpush.bf16.msrb.mxu2 %v1912_v22  ;;  %v2256_v53 = vld [vmem:[#allocation6 + $0x2c] sm:$0xf0]  ;;  %v1931_v54 = vld [vmem:[#allocation6 + $0x120] sm:$0xf]  ;;  %v1868_v60 = vor.u32 %v2280_v51, %v1867_v49  ;;  %v2052_v22 = vor.u32 %v2294_v14, %v2051_v13  ;;  %v2293_v29 = vld [vmem:[#allocation6 + $0xd0] sm:$0xf0] }
  0x5c   : > { %893 = vmatpush.bf16.msrb.mxu3 %v1944_v26  ;;  %v2264_v55 = vld [vmem:[#allocation6 + $0x12c] sm:$0xf0]  ;;  %v1831_v58 = vld [vmem:[#allocation6 + $0x200] sm:$0xf]  ;;  %v1900_v61 = vor.u32 %v2256_v53, %v1899_v52  ;;  %v2084_v26 = vor.u32 %v2302_v18, %v2083_v17  ;;  %v2079_v30 = vld [vmem:[#allocation6 + $0x1c4] sm:$0xf] }
  0x5d   : > { %759 = vmatpush.bf16.msrb.mxu0 %v1844_v32  ;;  %v2271_v59 = vld [vmem:[#allocation6 + $0x20c] sm:$0xf0]  ;;  %v1863_v62 = vld [vmem:[#allocation6 + $0x300] sm:$0xf]  ;;  %v1932_v1 = vor.u32 %v2264_v55, %v1931_v54  ;;  %v2301_v31 = vld [vmem:[#allocation6 + $0x1d0] sm:$0xf0]  ;;  %v1984_v32 = vor.u32 %v2309_v24, %v1983_v23 }
  0x5e   : > { %772 = vmatpush.bf16.msrb.mxu1 %v1876_v33  ;;  %v2279_v63 = vld [vmem:[#allocation6 + $0x30c] sm:$0xf0]  ;;  %v1895_v0 = vld [vmem:[#allocation6] sm:$0xf]  ;;  %v1832_v11 = vor.u32 %v2271_v59, %v1831_v58  ;;  %v2016_v33 = vor.u32 %v2317_v27, %v2015_v25  ;;  %v1979_v35 = vld [vmem:[#allocation6 + $0x2a4] sm:$0xf] }
  0x5f   : > { %881 = vmatpush.bf16.msrb.mxu2 %v1908_v34  ;;  %v2255_v2 = vld [vmem:[#allocation6 + $0xc] sm:$0xf0]  ;;  %v1927_v3 = vld [vmem:[#allocation6 + $0x100] sm:$0xf]  ;;  %v1864_v15 = vor.u32 %v2279_v63, %v1863_v62  ;;  %v2048_v34 = vor.u32 %v2293_v29, %v2047_v28  ;;  %v2308_v36 = vld [vmem:[#allocation6 + $0x2b0] sm:$0xf0] }
  0x60   : > { %894 = vmatpush.bf16.msrb.mxu3 %v1940_v38  ;;  %v2263_v4 = vld [vmem:[#allocation6 + $0x10c] sm:$0xf0]  ;;  %v1896_v16 = vor.u32 %v2255_v2, %v1895_v0  ;;  %v2011_v37 = vld [vmem:[#allocation6 + $0x3a4] sm:$0xf]  ;;  %v2080_v38 = vor.u32 %v2301_v31, %v2079_v30  ;;  %v2316_v39 = vld [vmem:[#allocation6 + $0x3b0] sm:$0xf0] }
  0x61   : > { %760 = vmatpush.bf16.msrb.mxu0 %v1840_v44  ;;  %v1928_v19 = vor.u32 %v2263_v4, %v1927_v3  ;;  %v2043_v40 = vld [vmem:[#allocation6 + $0xa4] sm:$0xf]  ;;  %v2292_v41 = vld [vmem:[#allocation6 + $0xb0] sm:$0xf0]  ;;  %v1980_v44 = vor.u32 %v2308_v36, %v1979_v35 }
  0x62   : > { %773 = vmatpush.bf16.msrb.mxu1 %v1872_v45  ;;  %v2075_v42 = vld [vmem:[#allocation6 + $0x1a4] sm:$0xf]  ;;  %v2300_v43 = vld [vmem:[#allocation6 + $0x1b0] sm:$0xf0]  ;;  %v2012_v45 = vor.u32 %v2316_v39, %v2011_v37 }
  0x63   : > { %882 = vmatpush.bf16.msrb.mxu2 %v1904_v46  ;;  %v2044_v46 = vor.u32 %v2292_v41, %v2043_v40  ;;  %v1975_v47 = vld [vmem:[#allocation6 + $0x284] sm:$0xf]  ;;  %v2307_v48 = vld [vmem:[#allocation6 + $0x290] sm:$0xf0] }
  0x64   : > { %895 = vmatpush.bf16.msrb.mxu3 %v1936_v50  ;;  %v2007_v49 = vld [vmem:[#allocation6 + $0x384] sm:$0xf]  ;;  %v2076_v50 = vor.u32 %v2300_v43, %v2075_v42  ;;  %v2315_v51 = vld [vmem:[#allocation6 + $0x390] sm:$0xf0] }
  0x65   : > { %761 = vmatpush.bf16.msrb.mxu0 %v1836_v56  ;;  %v2039_v52 = vld [vmem:[#allocation6 + $0x84] sm:$0xf]  ;;  %v2291_v53 = vld [vmem:[#allocation6 + $0x90] sm:$0xf0]  ;;  %v1976_v56 = vor.u32 %v2307_v48, %v1975_v47  ;;  %v2008_v58 = vor.u32 %v2315_v51, %v2007_v49  ;;  %v2350_v48 = vld [vmem:[#allocation6 + $0x3f4] sm:$0xf0] }
  0x66   : > { %774 = vmatpush.bf16.msrb.mxu1 %v1868_v60  ;;  %v2071_v54 = vld [vmem:[#allocation6 + $0x184] sm:$0xf]  ;;  %v2299_v55 = vld [vmem:[#allocation6 + $0x190] sm:$0xf0]  ;;  %v2040_v59 = vor.u32 %v2291_v53, %v2039_v52  ;;  %v2181_v49 = vld [vmem:[#allocation6 + $0xe8] sm:$0xf] }
  0x67   : > { %883 = vmatpush.bf16.msrb.mxu2 %v1900_v61  ;;  %v1971_v60 = vld [vmem:[#allocation6 + $0x264] sm:$0xf]  ;;  %v2306_v61 = vld [vmem:[#allocation6 + $0x270] sm:$0xf0]  ;;  %v2072_v63 = vor.u32 %v2299_v55, %v2071_v54  ;;  %v2213_v53 = vld [vmem:[#allocation6 + $0x1e8] sm:$0xf] }
  0x68   : > { %896 = vmatpush.bf16.msrb.mxu3 %v1932_v1  ;;  %v2003_v62 = vld [vmem:[#allocation6 + $0x364] sm:$0xf]  ;;  %v2314_v0 = vld [vmem:[#allocation6 + $0x370] sm:$0xf0]  ;;  %v1972_v8 = vor.u32 %v2306_v61, %v1971_v60  ;;  %v2334_v54 = vld [vmem:[#allocation6 + $0x1f4] sm:$0xf0] }
  0x69   : > { %762 = vmatpush.bf16.msrb.mxu0 %v1832_v11  ;;  %v2035_v1 = vld [vmem:[#allocation6 + $0x64] sm:$0xf]  ;;  %v2290_v2 = vld [vmem:[#allocation6 + $0x70] sm:$0xf0]  ;;  %v2004_v9 = vor.u32 %v2314_v0, %v2003_v62  ;;  %v2113_v60 = vld [vmem:[#allocation6 + $0x2c8] sm:$0xf] }
  0x6a   : > { %775 = vmatpush.bf16.msrb.mxu1 %v1864_v15  ;;  %v2067_v3 = vld [vmem:[#allocation6 + $0x164] sm:$0xf]  ;;  %v2298_v4 = vld [vmem:[#allocation6 + $0x170] sm:$0xf0]  ;;  %v2036_v10 = vor.u32 %v2290_v2, %v2035_v1  ;;  %v2341_v61 = vld [vmem:[#allocation6 + $0x2d4] sm:$0xf0] }
  0x6b   : > { %884 = vmatpush.bf16.msrb.mxu2 %v1896_v16  ;;  %v1967_v11 = vld [vmem:[#allocation6 + $0x244] sm:$0xf]  ;;  %v2305_v12 = vld [vmem:[#allocation6 + $0x250] sm:$0xf0]  ;;  %v2068_v14 = vor.u32 %v2298_v4, %v2067_v3  ;;  %v2145_v62 = vld [vmem:[#allocation6 + $0x3c8] sm:$0xf] }
  0x6c   : > { %897 = vmatpush.bf16.msrb.mxu3 %v1928_v19  ;;  %763 = vmatmul.bf16.vlgmr.msrb.gmra.mxu0 %v2786_v6  ;;  %v1999_v13 = vld [vmem:[#allocation6 + $0x344] sm:$0xf]  ;;  %v2313_v15 = vld [vmem:[#allocation6 + $0x350] sm:$0xf0]  ;;  %v2349_v0 = vld [vmem:[#allocation6 + $0x3d4] sm:$0xf0] }
  0x6d   : > { %1067 = vmatpush.bf16.msra.mxu0 %v1988_v20  ;;  %776 = vmatmul.bf16.vlgmr.msrb.gmra.mxu1 %v2788_v7  ;;  %v2031_v16 = vld [vmem:[#allocation6 + $0x44] sm:$0xf]  ;;  %v2289_v17 = vld [vmem:[#allocation6 + $0x50] sm:$0xf0]  ;;  %v1968_v20 = vor.u32 %v2305_v12, %v1967_v11  ;;  %v2177_v1 = vld [vmem:[#allocation6 + $0xc8] sm:$0xf] }
  0x6e   : > { %1080 = vmatpush.bf16.msra.mxu1 %v2020_v21  ;;  %885 = vmatmul.bf16.vlgmr.msrb.gmra.mxu2 %v2778_v57  ;;  %v2063_v18 = vld [vmem:[#allocation6 + $0x144] sm:$0xf]  ;;  %v2297_v19 = vld [vmem:[#allocation6 + $0x150] sm:$0xf0]  ;;  %v2000_v21 = vor.u32 %v2313_v15, %v1999_v13  ;;  %v2325_v2 = vld [vmem:[#allocation6 + $0xd4] sm:$0xf0] }
  0x6f   : > { %1189 = vmatpush.bf16.msra.mxu2 %v2052_v22  ;;  %898 = vmatmul.bf16.vlgmr.msrb.gmra.mxu3 %v2784_v5  ;;  %v2032_v22 = vor.u32 %v2289_v17, %v2031_v16  ;;  %v1963_v23 = vld [vmem:[#allocation6 + $0x224] sm:$0xf]  ;;  %v2304_v24 = vld [vmem:[#allocation6 + $0x230] sm:$0xf0]  ;;  %v2209_v3 = vld [vmem:[#allocation6 + $0x1c8] sm:$0xf] }
  0x70   : > { %1202 = vmatpush.bf16.msra.mxu3 %v2084_v26  ;;  %v1995_v25 = vld [vmem:[#allocation6 + $0x324] sm:$0xf]  ;;  %v2064_v26 = vor.u32 %v2297_v19, %v2063_v18  ;;  %v2312_v27 = vld [vmem:[#allocation6 + $0x330] sm:$0xf0]  ;;  %v2333_v4 = vld [vmem:[#allocation6 + $0x1d4] sm:$0xf0] }
  0x71   : > { %1068 = vmatpush.bf16.msra.mxu0 %v1984_v32  ;;  %v2027_v28 = vld [vmem:[#allocation6 + $0x24] sm:$0xf]  ;;  %v2288_v29 = vld [vmem:[#allocation6 + $0x30] sm:$0xf0]  ;;  %v1964_v32 = vor.u32 %v2304_v24, %v1963_v23  ;;  %v1996_v35 = vor.u32 %v2312_v27, %v1995_v25  ;;  %v2109_v11 = vld [vmem:[#allocation6 + $0x2a8] sm:$0xf] }
  0x72   : > { %1081 = vmatpush.bf16.msra.mxu1 %v2016_v33  ;;  %v2059_v30 = vld [vmem:[#allocation6 + $0x124] sm:$0xf]  ;;  %v2296_v31 = vld [vmem:[#allocation6 + $0x130] sm:$0xf0]  ;;  %v2028_v36 = vor.u32 %v2288_v29, %v2027_v28  ;;  %v2340_v12 = vld [vmem:[#allocation6 + $0x2b4] sm:$0xf0] }
  0x73   : > { %1190 = vmatpush.bf16.msra.mxu2 %v2048_v34  ;;  %v1959_v33 = vld [vmem:[#allocation6 + $0x204] sm:$0xf]  ;;  %v2303_v34 = vld [vmem:[#allocation6 + $0x210] sm:$0xf0]  ;;  %v2060_v40 = vor.u32 %v2296_v31, %v2059_v30  ;;  %v2141_v13 = vld [vmem:[#allocation6 + $0x3a8] sm:$0xf] }
  0x74   : > { %1203 = vmatpush.bf16.msra.mxu3 %v2080_v38  ;;  %v1991_v37 = vld [vmem:[#allocation6 + $0x304] sm:$0xf]  ;;  %v2311_v38 = vld [vmem:[#allocation6 + $0x310] sm:$0xf0]  ;;  %v1960_v47 = vor.u32 %v2303_v34, %v1959_v33  ;;  %v2348_v15 = vld [vmem:[#allocation6 + $0x3b4] sm:$0xf0] }
  0x75   : > { %1069 = vmatpush.bf16.msra.mxu0 %v1980_v44  ;;  %v2023_v39 = vld [vmem:[#allocation6 + $0x4] sm:$0xf]  ;;  %v2287_v41 = vld [vmem:[#allocation6 + $0x10] sm:$0xf0]  ;;  %v2117_v44 = vld [vmem:[#allocation6 + $0x2e8] sm:$0xf]  ;;  %v1992_v51 = vor.u32 %v2311_v38, %v1991_v37 }
  0x76   : > { %1082 = vmatpush.bf16.msra.mxu1 %v2012_v45  ;;  %v2055_v42 = vld [vmem:[#allocation6 + $0x104] sm:$0xf]  ;;  %v2295_v43 = vld [vmem:[#allocation6 + $0x110] sm:$0xf0]  ;;  %v2342_v45 = vld [vmem:[#allocation6 + $0x2f4] sm:$0xf0]  ;;  %v2024_v52 = vor.u32 %v2287_v41, %v2023_v39 }
  0x77   : > { %1191 = vmatpush.bf16.msra.mxu2 %v2044_v46  ;;  %v2149_v46 = vld [vmem:[#allocation6 + $0x3e8] sm:$0xf]  ;;  %v2056_v55 = vor.u32 %v2295_v43, %v2055_v42  ;;  %v2324_v17 = vld [vmem:[#allocation6 + $0xb4] sm:$0xf0] }
  0x78   : > { %1204 = vmatpush.bf16.msra.mxu3 %v2076_v50  ;;  %v2326_v50 = vld [vmem:[#allocation6 + $0xf4] sm:$0xf0]  ;;  %v2173_v16 = vld [vmem:[#allocation6 + $0xa8] sm:$0xf] }
  0x79   : > { %1070 = vmatpush.bf16.msra.mxu0 %v1976_v56  ;;  %v2118_v56 = vor.u32 %v2342_v45, %v2117_v44  ;;  %v2205_v18 = vld [vmem:[#allocation6 + $0x1a8] sm:$0xf]  ;;  %v2332_v19 = vld [vmem:[#allocation6 + $0x1b4] sm:$0xf0] }
  0x7a   : > { %1083 = vmatpush.bf16.msra.mxu1 %v2008_v58  ;;  %v2150_v58 = vor.u32 %v2350_v48, %v2149_v46  ;;  %v2105_v23 = vld [vmem:[#allocation6 + $0x288] sm:$0xf]  ;;  %v2339_v24 = vld [vmem:[#allocation6 + $0x294] sm:$0xf0] }
  0x7b   : > { %1192 = vmatpush.bf16.msra.mxu2 %v2040_v59  ;;  %v2182_v59 = vor.u32 %v2326_v50, %v2181_v49  ;;  %v2137_v25 = vld [vmem:[#allocation6 + $0x388] sm:$0xf]  ;;  %v2347_v27 = vld [vmem:[#allocation6 + $0x394] sm:$0xf0] }
  0x7c   : > { %1205 = vmatpush.bf16.msra.mxu3 %v2072_v63  ;;  %v2214_v63 = vor.u32 %v2334_v54, %v2213_v53  ;;  %v2169_v28 = vld [vmem:[#allocation6 + $0x88] sm:$0xf]  ;;  %v2323_v29 = vld [vmem:[#allocation6 + $0x94] sm:$0xf0]  ;;  %v2138_v33 = vor.u32 %v2347_v27, %v2137_v25  ;;  %v2630_v25 = vmov 0.0  }
  0x7d   : > { %1071 = vmatpush.bf16.msra.mxu0 %v1972_v8  ;;  %v2114_v8 = vor.u32 %v2341_v61, %v2113_v60  ;;  %v2201_v30 = vld [vmem:[#allocation6 + $0x188] sm:$0xf]  ;;  %v2331_v31 = vld [vmem:[#allocation6 + $0x194] sm:$0xf0]  ;;  %v2170_v34 = vor.u32 %v2323_v29, %v2169_v28  ;;  %272 = vst [vmem:[%s2806_s25] sm:$0x7] %v2630_v25 }
  0x7e   : > { %1084 = vmatpush.bf16.msra.mxu1 %v2004_v9  ;;  %v2146_v9 = vor.u32 %v2349_v0, %v2145_v62  ;;  %v2133_v37 = vld [vmem:[#allocation6 + $0x368] sm:$0xf]  ;;  %v2202_v38 = vor.u32 %v2331_v31, %v2201_v30  ;;  %v2346_v39 = vld [vmem:[#allocation6 + $0x374] sm:$0xf0]  ;;  %273 = vst [vmem:[%s2806_s25 + $0xb] sm:$0x1f] %v2630_v25 }
  0x7f   : > { %1193 = vmatpush.bf16.msra.mxu2 %v2036_v10  ;;  %v2178_v10 = vor.u32 %v2325_v2, %v2177_v1  ;;  %v2322_v41 = vld [vmem:[#allocation6 + $0x74] sm:$0xf0]  ;;  %v2197_v42 = vld [vmem:[#allocation6 + $0x168] sm:$0xf]  ;;  %v2134_v45 = vor.u32 %v2346_v39, %v2133_v37 }
  0x80   : > { %1206 = vmatpush.bf16.msra.mxu3 %v2068_v14  ;;  %v2210_v14 = vor.u32 %v2333_v4, %v2209_v3  ;;  %v2330_v43 = vld [vmem:[#allocation6 + $0x174] sm:$0xf0]  ;;  %v2129_v49 = vld [vmem:[#allocation6 + $0x348] sm:$0xf] }
  0x81   : > { %1072 = vmatpush.bf16.msra.mxu0 %v1968_v20  ;;  %v2110_v20 = vor.u32 %v2340_v12, %v2109_v11  ;;  %v2337_v48 = vld [vmem:[#allocation6 + $0x254] sm:$0xf0]  ;;  %v2198_v50 = vor.u32 %v2330_v43, %v2197_v42  ;;  %v2193_v54 = vld [vmem:[#allocation6 + $0x148] sm:$0xf] }
  0x82   : > { %1085 = vmatpush.bf16.msra.mxu1 %v2000_v21  ;;  %v2142_v21 = vor.u32 %v2348_v15, %v2141_v13  ;;  %v2321_v53 = vld [vmem:[#allocation6 + $0x54] sm:$0xf0]  ;;  %v2093_v60 = vld [vmem:[#allocation6 + $0x228] sm:$0xf] }
  0x83   : > { %1194 = vmatpush.bf16.msra.mxu2 %v2032_v22  ;;  %v2174_v22 = vor.u32 %v2324_v17, %v2173_v16  ;;  %v2336_v61 = vld [vmem:[#allocation6 + $0x234] sm:$0xf0]  ;;  %v2125_v62 = vld [vmem:[#allocation6 + $0x328] sm:$0xf] }
  0x84   : > { %1207 = vmatpush.bf16.msra.mxu3 %v2064_v26  ;;  %v2206_v26 = vor.u32 %v2332_v19, %v2205_v18  ;;  %v2344_v0 = vld [vmem:[#allocation6 + $0x334] sm:$0xf0]  ;;  %v2157_v1 = vld [vmem:[#allocation6 + $0x28] sm:$0xf] }
  0x85   : > { %1073 = vmatpush.bf16.msra.mxu0 %v1964_v32  ;;  %v2106_v32 = vor.u32 %v2339_v24, %v2105_v23  ;;  %v2320_v2 = vld [vmem:[#allocation6 + $0x34] sm:$0xf0]  ;;  %v2189_v3 = vld [vmem:[#allocation6 + $0x128] sm:$0xf] }
  0x86   : > { %1086 = vmatpush.bf16.msra.mxu1 %v1996_v35  ;;  %v2101_v35 = vld [vmem:[#allocation6 + $0x268] sm:$0xf]  ;;  %v2328_v4 = vld [vmem:[#allocation6 + $0x134] sm:$0xf0] }
  0x87   : > { %1195 = vmatpush.bf16.msra.mxu2 %v2028_v36  ;;  %v2338_v36 = vld [vmem:[#allocation6 + $0x274] sm:$0xf0]  ;;  %v2089_v11 = vld [vmem:[#allocation6 + $0x208] sm:$0xf] }
  0x88   : > { %1208 = vmatpush.bf16.msra.mxu3 %v2060_v40  ;;  %v2165_v40 = vld [vmem:[#allocation6 + $0x68] sm:$0xf]  ;;  %v2102_v44 = vor.u32 %v2338_v36, %v2101_v35  ;;  %v2335_v12 = vld [vmem:[#allocation6 + $0x214] sm:$0xf0] }
  0x89   : > { %1074 = vmatpush.bf16.msra.mxu0 %v1960_v47  ;;  %v2166_v46 = vor.u32 %v2322_v41, %v2165_v40  ;;  %v2097_v47 = vld [vmem:[#allocation6 + $0x248] sm:$0xf]  ;;  %v2343_v15 = vld [vmem:[#allocation6 + $0x314] sm:$0xf0] }
  0x8a   : > { %1087 = vmatpush.bf16.msra.mxu1 %v1992_v51  ;;  %v2345_v51 = vld [vmem:[#allocation6 + $0x354] sm:$0xf0]  ;;  %v2121_v13 = vld [vmem:[#allocation6 + $0x308] sm:$0xf] }
  0x8b   : > { %1196 = vmatpush.bf16.msra.mxu2 %v2024_v52  ;;  %v2161_v52 = vld [vmem:[#allocation6 + $0x48] sm:$0xf]  ;;  %v2319_v17 = vld [vmem:[#allocation6 + $0x14] sm:$0xf0] }
  0x8c   : > { %1209 = vmatpush.bf16.msra.mxu3 %v2056_v55  ;;  %1075 = vmatmul.bf16.vlgmr.msra.gmra.mxu0 %v2786_v6  ;;  %v2329_v55 = vld [vmem:[#allocation6 + $0x154] sm:$0xf0]  ;;  %v2153_v16 = vld [vmem:[#allocation6 + $0x8] sm:$0xf] }
  0x8d   : > { %1380 = vmatpush.bf16.msrb.mxu0 %v2118_v56  ;;  %1088 = vmatmul.bf16.vlgmr.msra.gmra.mxu1 %v2788_v7  ;;  %v2098_v56 = vor.u32 %v2337_v48, %v2097_v47  ;;  %v2185_v18 = vld [vmem:[#allocation6 + $0x108] sm:$0xf]  ;;  %v2327_v19 = vld [vmem:[#allocation6 + $0x114] sm:$0xf0] }
  0x8e   : > { %1393 = vmatpush.bf16.msrb.mxu1 %v2150_v58  ;;  %1197 = vmatmul.bf16.vlgmr.msra.gmra.mxu2 %v2778_v57  ;;  %v2130_v58 = vor.u32 %v2345_v51, %v2129_v49  ;;  %v2186_v23 = vor.u32 %v2327_v19, %v2185_v18 }
  0x8f   : > { %1502 = vmatpush.bf16.msrb.mxu2 %v2182_v59  ;;  %1210 = vmatmul.bf16.vlgmr.msra.gmra.mxu3 %v2784_v5  ;;  %v2162_v59 = vor.u32 %v2321_v53, %v2161_v52 }
  0x90   : > { %1515 = vmatpush.bf16.msrb.mxu3 %v2214_v63  ;;  %v2194_v63 = vor.u32 %v2329_v55, %v2193_v54 }
  0x91   : > { %1381 = vmatpush.bf16.msrb.mxu0 %v2114_v8  ;;  %v2094_v8 = vor.u32 %v2336_v61, %v2093_v60 }
  0x92   : > { %1394 = vmatpush.bf16.msrb.mxu1 %v2146_v9  ;;  %v2126_v9 = vor.u32 %v2344_v0, %v2125_v62 }
  0x93   : > { %1503 = vmatpush.bf16.msrb.mxu2 %v2178_v10  ;;  %v2158_v10 = vor.u32 %v2320_v2, %v2157_v1 }
  0x94   : > { %1516 = vmatpush.bf16.msrb.mxu3 %v2210_v14  ;;  %v2190_v14 = vor.u32 %v2328_v4, %v2189_v3  ;;  %v1536_v3 = vld [vmem:[#allocation8] sm:$0xff] }
  0x95   : > { %1382 = vmatpush.bf16.msrb.mxu0 %v2110_v20  ;;  %v2090_v20 = vor.u32 %v2335_v12, %v2089_v11  ;;  %v1538_v11 = vadd.f32 1e-07, %v1536_v3 }
  0x96   : > { %1395 = vmatpush.bf16.msrb.mxu1 %v2142_v21  ;;  %v2122_v21 = vor.u32 %v2343_v15, %v2121_v13  ;;  %v1545_v15 = vstv %s1544_s30 }
  0x97   : > { %1504 = vmatpush.bf16.msrb.mxu2 %v2174_v22  ;;  %v2154_v22 = vor.u32 %v2319_v17, %v2153_v16  ;;  %2442 = vrcp.f32 %v1538_v11 }
  0x98   : > { %1517 = vmatpush.bf16.msrb.mxu3 %v2206_v26 }
  0x99   : > { %1383 = vmatpush.bf16.msrb.mxu0 %v2106_v32 }
  0x9a   : > { %1396 = vmatpush.bf16.msrb.mxu1 %v2138_v33 }
  0x9b   : > { %1505 = vmatpush.bf16.msrb.mxu2 %v2170_v34 }
  0x9c   : > { %1518 = vmatpush.bf16.msrb.mxu3 %v2202_v38 }
  0x9d   : > { %1384 = vmatpush.bf16.msrb.mxu0 %v2102_v44  ;;  %v2443_v18 = vpop.eup %2442 }
  0x9e   : > { %1397 = vmatpush.bf16.msrb.mxu1 %v2134_v45 }
  0x9f   : > { %1506 = vmatpush.bf16.msrb.mxu2 %v2166_v46 }
  0xa0   : > { %1519 = vmatpush.bf16.msrb.mxu3 %v2198_v50 }
  0xa1   : > { %1385 = vmatpush.bf16.msrb.mxu0 %v2098_v56 }
  0xa2   : > { %1398 = vmatpush.bf16.msrb.mxu1 %v2130_v58 }
  0xa3   : > { %1507 = vmatpush.bf16.msrb.mxu2 %v2162_v59 }
  0xa4   : > { %1520 = vmatpush.bf16.msrb.mxu3 %v2194_v63 }
  0xa5   : > { %1386 = vmatpush.bf16.msrb.mxu0 %v2094_v8  ;;  %v1537_v8 = vld [vmem:[#allocation8 + $0x8] sm:$0xff] }
  0xa6   : > { %1399 = vmatpush.bf16.msrb.mxu1 %v2126_v9  ;;  %v1539_v12 = vadd.f32 1e-07, %v1537_v8 }
  0xa7   : > { %1508 = vmatpush.bf16.msrb.mxu2 %v2158_v10 }
  0xa8   : > { %1521 = vmatpush.bf16.msrb.mxu3 %v2190_v14  ;;  %2444 = vrcp.f32 %v1539_v12 }
  0xa9   : > { %1387 = vmatpush.bf16.msrb.mxu0 %v2090_v20 }
  0xaa   : > { %1400 = vmatpush.bf16.msrb.mxu1 %v2122_v21 }
  0xab   : > { %1509 = vmatpush.bf16.msrb.mxu2 %v2154_v22 }
  0xac   : > { %1522 = vmatpush.bf16.msrb.mxu3 %v2186_v23  ;;  %1388 = vmatmul.bf16.vlgmr.msrb.gmra.mxu0 %v2786_v6 }
  0xad   : > { %1401 = vmatmul.bf16.vlgmr.msrb.gmra.mxu1 %v2788_v7 }
  0xae   : > { %1510 = vmatmul.bf16.vlgmr.msrb.gmra.mxu2 %v2778_v57  ;;  %v2445_v21 = vpop.eup %2444 }
  0xaf   : > { %1523 = vmatmul.bf16.vlgmr.msrb.gmra.mxu3 %v2784_v5 }
  0xcc   : > { %v453_v24 = vpop.f32.mrf.mxu0 }
  0xcd   : > { %v466_v26 = vpop.f32.mrf.mxu1 }
  0xce   : > { %v467_v27 = vadd.f32 %v466_v26, %v453_v24 }
  0xd1   : > { %v575_v6 = vpop.f32.mrf.mxu2 }
  0xd2   : > { %v576_v28 = vadd.f32 %v575_v6, %v467_v27 }
  0xd4   : > { %v588_v7 = vpop.f32.mrf.mxu3  ;;  %v455_v57 = vpop.f32.mrf.mxu0 }
  0xd5   : > { %v589_v29 = vadd.f32 %v588_v7, %v576_v28  ;;  %v468_v5 = vpop.f32.mrf.mxu1 }
  0xd7   : > { %1828 = vst [vmem:[%s2806_s25 + $0x3] sm:$0xff] %v589_v29 }
  0xd9   : > { %v577_v30 = vpop.f32.mrf.mxu2 }
  0xdc   : > { %v590_v31 = vpop.f32.mrf.mxu3 }
  0xde   : > { %v904_v38 = vld [vmem:[%s2806_s25] sm:$0xff] }
  0xe9   : > { %v764_v32 = vpop.f32.mrf.mxu0 }
  0xea   : > { %v777_v33 = vpop.f32.mrf.mxu1 }
  0xeb   : > { %v778_v34 = vadd.f32 %v777_v33, %v764_v32 }
  0xf1   : > { %v886_v35 = vpop.f32.mrf.mxu2  ;;  %v766_v40 = vpop.f32.mrf.mxu0 }
  0xf2   : > { %v887_v36 = vadd.f32 %v886_v35, %v778_v34  ;;  %v899_v37 = vpop.f32.mrf.mxu3  ;;  %v779_v41 = vpop.f32.mrf.mxu1 }
  0xf4   : > { %v900_v39 = vadd.f32 %v899_v37, %v887_v36 }
  0xf6   : > { %v905_v42 = vadd.f32 %v904_v38, %v900_v39 }
  0xf8   : > { %906 = vst [vmem:[%s2806_s25] sm:$0xff] %v905_v42 }
  0xf9   : > { %v888_v43 = vpop.f32.mrf.mxu2 }
  0xfa   : > { %v901_v44 = vpop.f32.mrf.mxu3 }
  0xff   : > { %v2085_v53 = vld [vmem:[%s2806_s25 + $0x1] sm:$0xff] }
 0x109   : > { %v1076_v45 = vpop.f32.mrf.mxu0 }
 0x10a   : > { %v1089_v46 = vpop.f32.mrf.mxu1 }
 0x10b   : > { %v1090_v47 = vadd.f32 %v1089_v46, %v1076_v45 }
 0x111   : > { %v1198_v48 = vpop.f32.mrf.mxu2  ;;  %v1078_v52 = vpop.f32.mrf.mxu0 }
 0x112   : > { %v1199_v49 = vadd.f32 %v1198_v48, %v1090_v47  ;;  %v1211_v50 = vpop.f32.mrf.mxu3  ;;  %v1091_v54 = vpop.f32.mrf.mxu1 }
 0x114   : > { %v1212_v51 = vadd.f32 %v1211_v50, %v1199_v49 }
 0x116   : > { %v1218_v55 = vadd.f32 %v2085_v53, %v1212_v51 }
 0x118   : > { %2086 = vst [vmem:[%s2806_s25 + $0x1] sm:$0xff] %v1218_v55 }
 0x119   : > { %v1200_v56 = vpop.f32.mrf.mxu2 }
 0x11a   : > { %v1213_v58 = vpop.f32.mrf.mxu3 }
 0x11f   : > { %v2215_v9 = vld [vmem:[%s2806_s25 + $0x2] sm:$0xff] }
 0x129   : > { %v1389_v59 = vpop.f32.mrf.mxu0 }
 0x12a   : > { %v1402_v60 = vpop.f32.mrf.mxu1 }
 0x12b   : > { %v1403_v61 = vadd.f32 %v1402_v60, %v1389_v59 }
 0x131   : > { %v1511_v62 = vpop.f32.mrf.mxu2  ;;  %v1391_v1 = vpop.f32.mrf.mxu0 }
 0x132   : > { %v1512_v63 = vadd.f32 %v1511_v62, %v1403_v61  ;;  %v1524_v0 = vpop.f32.mrf.mxu3  ;;  %v1404_v2 = vpop.f32.mrf.mxu1 }
 0x134   : > { %v1525_v4 = vadd.f32 %v1524_v0, %v1512_v63 }
 0x136   : > { %v1531_v10 = vadd.f32 %v2215_v9, %v1525_v4 }
 0x138   : > { %2216 = vst [vmem:[%s2806_s25 + $0x2] sm:$0xff] %v1531_v10 }
 0x139   : > { %v1513_v13 = vpop.f32.mrf.mxu2 }
 0x13a   : > { %v1526_v14 = vpop.f32.mrf.mxu3 }
 0x13f   : > { %v1542_v16 = vld [vmem:[%s2806_s25] sm:$0xff]  ;;  %v1543_v17 = vld [vmem:[%s2806_s25 + $0x8] sm:$0xff] }
 0x140   : > { %v1546_v19 = vadd.f32 %v1545_v15, %v1542_v16  ;;  %v1547_v20 = vadd.f32 %v1545_v15, %v1543_v17 }
 0x142   : > { %v1548_v22 = vmul.f32 2.0, %v1546_v19  ;;  %v1549_v23 = vmul.f32 2.0, %v1547_v20 }
 0x144   : > { %v1550_v24 = vmul.f32 %v2443_v18, %v1548_v22  ;;  %v1551_v25 = vmul.f32 %v2445_v21, %v1549_v23 }
 0x146   : > { %1552 = vst [vmem:[%s2806_s25] sm:$0xff] %v1550_v24 }
 0x147   : > { %1553 = vst [vmem:[%s2806_s25 + $0x8] sm:$0xff] %v1551_v25 }
 0x148   : > { %2563 = shalt.err (!%p2560_p0)
}
 0x149   : > { %s2631_s23 = smov 128   ;;  %s2632_s24 = smov 8  }
 0x14a   : > { %2362 = dma.vmem_to_hbm [thread:$0]  (%p2740_p2), %s1568_s8, 256, %s1570_s9, %s1555_s20, %s2631_s23, %s2631_s23, %s2632_s24  }
 0x14b PF: > { %s1584_s25 = sand.u32 1, %s2602_s17   ;;  %p2376_p4 = pnand %p1689_p10, %p2708_p5 }
 0x14c   : > { %s1585_s30 = scalar_lea.sflag [#allocation5], %s1584_s25 }
 0x14d   : > { %p2377_p6 = pneg %p2376_p4 }
 0x14f   : > { %2597 = dma.done.wait (%p2377_p6), %s1585_s30, 256  }
 0x150   : > { %2599 = vsyncadd (%p2377_p6), %s1585_s30, 4294967040  ;;  %s22_s22 = sadd.s32 1, %s2622_s22   ;;  %s2870_s17 = smov %s2606_s18 }
 0x151   : > { %p19_p8 = scmp.ge.s32.totalorder %s22_s22, 4   ;;  %s2871_s18 = smov %s2610_s19 }
 0x152   : > { %s2872_s19 = smov %s2750_s6  ;;  %s2873_s20 = smov %s2618_s21 }
 0x153   : > { %s2874_s21 = smov %s2876_s16  ;;  %21 = sbr.rel (!%p19_p8) target bundleno = 9 (0x9), region = 102 }
 0x158   :  { %1591 = vsyncpa [#allocation4], 1 }
 0x159   :  { %1593 = vsyncpa [#allocation4 + $0x1], 1 }
 0x15a   :  { %1594 = vsyncpa [#allocation7], 1 }
 0x15b   :  { %1595 = vsyncpa [#allocation5], 1 }
 0x15c   :  { %1597 = vsyncpa [#allocation5 + $0x1], 1 }

</bundles_post_ra>
